<compile_context>
chip_gen: v7x
topology: tpu7x:2x2x1
jax: 0.10.0
libtpu: 0.0.40
codegen_flags: <defaults>
</compile_context>

<pallas_src>
import functools

import jax
import jax.numpy as jnp
from jax.experimental import pallas as pl
from jax.experimental.pallas import tpu as pltpu

INPUT_DIM = 32
HIDDEN_DIM = 150   # PyTorch default; 150 pads to 256 lanes in-kernel. 128 would remove the
                   # padding (review item), but 150 is kept to match the reference module.
LN_EPS = 1e-5


# ---------------------------------------------------------------------------
# Shared per-row-block math: packed concat -> single MXU dot -> ReLU -> folded LN+Linear.
# ---------------------------------------------------------------------------
def _score_block(s1, s2, w1, b1, v, sv, c):
    """s1: (1|T, H) f32, s2: (T, H) f32 -> (T, 1) f32 scores."""
    s1 = jnp.broadcast_to(s1, s2.shape)                          # no-op when shapes match
    # diff / prod in f32 (review correctness note), one bf16 cast right before the dot.
    feats = jnp.concatenate([s1, s2, s1 - s2, s1 * s2], axis=-1)  # (T, 4H=128) f32
    h = jnp.dot(feats.astype(w1.dtype), w1,
                preferred_element_type=jnp.float32) + b1          # (T, hid) f32 on MXU
    h = jnp.maximum(h, 0.0)                                       # ReLU
    mu = jnp.mean(h, axis=-1, keepdims=True)
    var = jnp.maximum(jnp.mean(h * h, axis=-1, keepdims=True) - mu * mu, 0.0)  # E[h^2]-mu^2
    rs = jax.lax.rsqrt(var + LN_EPS)
    # Folded LayerNorm affine + Linear(hid, 1):  score = rs*(sum(h*v) - mu*sv) + c
    return rs * (jnp.sum(h * v, axis=-1, keepdims=True) - mu * sv) + c


def _pairwise_kernel(s1_ref, s2_ref, w1_ref, b1_ref, v_ref, sv_ref, c_ref, out_ref):
    out_ref[...] = _score_block(s1_ref[...], s2_ref[...], w1_ref[...], b1_ref[...],
                                v_ref[...], sv_ref[...], c_ref[...])


def _allpairs_kernel(si_ref, sj_ref, w1_ref, b1_ref, v_ref, sv_ref, c_ref, out_ref):
    # si_ref: (Ti, H) spans i-tile, sj_ref: (Tj, H) spans j-tile, out_ref: (Ti, Tj, 1).
    s_i_all = si_ref[...]
    s_j = sj_ref[...]
    w1, b1, v, sv, c = w1_ref[...], b1_ref[...], v_ref[...], sv_ref[...], c_ref[...]
    for l in range(si_ref.shape[0]):                              # Ti <= 8, static unroll
        out_ref[l] = _score_block(s_i_all[l:l + 1], s_j, w1, b1, v, sv, c)


# ---------------------------------------------------------------------------
# Parameters (PyTorch-equivalent layout) and one-time offline folding.
# ---------------------------------------------------------------------------
def init_params(key, input_dim=INPUT_DIM, hidden_dim=HIDDEN_DIM):
    ks = jax.random.split(key, 4)

    def g(k, shape, scale=0.05):
        return jax.random.normal(k, shape, jnp.float32) * scale

    return {
        "w1": g(ks[0], (4 * input_dim, hidden_dim)),     # x @ w1 == PyTorch x @ W1.T
        "b1": g(ks[1], (hidden_dim,)),
        "ln_gamma": jnp.ones((hidden_dim,), jnp.float32),
        "ln_beta": jnp.zeros((hidden_dim,), jnp.float32),
        "w2": g(ks[2], (hidden_dim, 1)),
        "b2": g(ks[3], (1,)),
    }


def fold_params(params, compute_dtype=jnp.bfloat16):
    """Offline folding: bf16 W1 for the MXU, and gamma/beta/w2/b2 folded into (v, sv, c)."""
    hid = params["w1"].shape[1]
    w2 = params["w2"].reshape(-1)                                  # (hid,)
    v = params["ln_gamma"] * w2
    return {
        "w1": params["w1"].astype(compute_dtype),                  # (4H, hid)
        "b1": params["b1"].reshape(1, hid).astype(jnp.float32),
        "v":  v.reshape(1, hid).astype(jnp.float32),
        "sv": jnp.sum(v).reshape(1, 1).astype(jnp.float32),
        "c":  (jnp.sum(params["ln_beta"] * w2) + params["b2"][0]).reshape(1, 1)
              .astype(jnp.float32),
    }


def _pick_row_tile(m):
    # Biggest tile that amortizes the ~0.35us/step overhead while keeping >=2 grid steps
    # (so the "parallel" grid axis can use both TensorCores on v7x).
    if m <= 128:
        return m                     # single full block (block dims == array dims)
    for t in (512, 256, 128):
        if m >= 2 * t:
            return t
    return 128


# ---------------------------------------------------------------------------
# Wrappers.
# ---------------------------------------------------------------------------
@jax.jit
def pairwise_scorer(folded, span1, span2):
    """Elementwise-paired scoring over arbitrary leading dims: (..., H), (..., H) -> (...)."""
    lead = span1.shape[:-1]
    h_dim = span1.shape[-1]
    hid = folded["b1"].shape[-1]

    s1 = span1.reshape(-1, h_dim)                 # f32 straight from HBM; cast happens in-kernel
    s2 = span2.reshape(-1, h_dim)
    m = s1.shape[0]
    row_tile = _pick_row_tile(m)

    row_spec = pl.BlockSpec((row_tile, h_dim), lambda i: (i, 0))
    def w_spec(shape):                            # weights: same (resident) block every step
        return pl.BlockSpec(shape, lambda i: (0, 0))

    # TODO(synk): (m, 1) scores are sublane-major (masked stores); output bytes are <1/60 of
    # input bytes here so the store path is not the bottleneck — a lane-dense slab would need
    # an in-kernel sublane->lane relayout we avoid for lowering robustness.
    out = pl.pallas_call(
        _pairwise_kernel,
        grid=(pl.cdiv(m, row_tile),),
        in_specs=[row_spec, row_spec,
                  w_spec((4 * h_dim, hid)), w_spec((1, hid)), w_spec((1, hid)),
                  w_spec((1, 1)), w_spec((1, 1))],
        out_specs=pl.BlockSpec((row_tile, 1), lambda i: (i, 0)),
        out_shape=jax.ShapeDtypeStruct((m, 1), jnp.float32),
        compiler_params=pltpu.CompilerParams(dimension_semantics=("parallel",)),
    )(s1, s2, folded["w1"], folded["b1"], folded["v"], folded["sv"], folded["c"])

    return out[:, 0].reshape(lead)


@jax.jit
def score_all_pairs(folded, span_repr):
    """All (i, j) pair scores of one span set: (..., n, H) -> (..., n, n).
    Pairs are formed in VMEM from the original span table (no (n, n, H) HBM broadcast)."""
    lead = span_repr.shape[:-2]
    n, h_dim = span_repr.shape[-2:]
    hid = folded["b1"].shape[-1]

    spans = span_repr.reshape(-1, n, h_dim)
    b = spans.shape[0]
    ti = 8 if n >= 8 else n                        # small i-tile, statically unrolled in-kernel
    tj = 128 if n >= 128 else n                    # j-tile along rows of the MXU matmul

    si_spec = pl.BlockSpec((None, ti, h_dim), lambda bb, i, j: (bb, i, 0))
    sj_spec = pl.BlockSpec((None, tj, h_dim), lambda bb, i, j: (bb, j, 0))
    def w_spec(shape):
        return pl.BlockSpec(shape, lambda bb, i, j: (0, 0))

    out = pl.pallas_call(
        _allpairs_kernel,
        grid=(b, pl.cdiv(n, ti), pl.cdiv(n, tj)),
        in_specs=[si_spec, sj_spec,
                  w_spec((4 * h_dim, hid)), w_spec((1, hid)), w_spec((1, hid)),
                  w_spec((1, 1)), w_spec((1, 1))],
        out_specs=pl.BlockSpec((None, ti, tj, 1), lambda bb, i, j: (bb, i, j, 0)),
        out_shape=jax.ShapeDtypeStruct((b, n, n, 1), jnp.float32),
        compiler_params=pltpu.CompilerParams(
            dimension_semantics=("parallel", "parallel", "parallel")),
    )(spans, spans, folded["w1"], folded["b1"], folded["v"], folded["sv"], folded["c"])

    return out[..., 0].reshape(*lead, n, n)


# ---------------------------------------------------------------------------
# Pure-JAX reference (mirrors the PyTorch module exactly, f32; Dropout = eval identity).
# ---------------------------------------------------------------------------
def pairwise_scorer_ref(params, span1, span2):
    feats = jnp.concatenate([span1, span2, span1 - span2, span1 * span2], axis=-1)
    h = feats @ params["w1"] + params["b1"]
    h = jnp.maximum(h, 0.0)
    mu = h.mean(-1, keepdims=True)
    var = ((h - mu) ** 2).mean(-1, keepdims=True)
    hn = (h - mu) / jnp.sqrt(var + LN_EPS)
    hn = hn * params["ln_gamma"] + params["ln_beta"]
    return (hn @ params["w2"] + params["b2"])[..., 0]


if __name__ == "__main__":
    key = jax.random.PRNGKey(0)
    k_params, k_s1, k_s2, k_repr = jax.random.split(key, 4)

    params = init_params(k_params)
    folded = fold_params(params)                                   # one-time offline folding

    B, N, H = 2, 128, INPUT_DIM
    span1 = jax.random.normal(k_s1, (B, N, H), jnp.float32)
    span2 = jax.random.normal(k_s2, (B, N, H), jnp.float32)

    scores = jax.block_until_ready(pairwise_scorer(folded, span1, span2))      # (B, N)
    ref = pairwise_scorer_ref(params, span1, span2)
    err = float(jnp.max(jnp.abs(scores - ref)))
    assert scores.shape == (B, N), scores.shape
    assert err < 7.5e-2, f"row-kernel mismatch vs reference: max abs err = {err}"

    # All-pairs antecedent matrix: (B, n, n) formed in-kernel, no HBM broadcast.
    n = 16
    span_repr = jax.random.normal(k_repr, (B, n, H), jnp.float32)
    pair_mat = jax.block_until_ready(score_all_pairs(folded, span_repr))       # (B, n, n)
    s1b = jnp.broadcast_to(span_repr[:, :, None, :], (B, n, n, H))
    s2b = jnp.broadcast_to(span_repr[:, None, :, :], (B, n, n, H))
    ref_pairs = pairwise_scorer_ref(params, s1b, s2b)
    err2 = float(jnp.max(jnp.abs(pair_mat - ref_pairs)))
    assert pair_mat.shape == (B, n, n), pair_mat.shape
    assert err2 < 7.5e-2, f"all-pairs mismatch vs reference: max abs err = {err2}"

    print("KERNEL_OK")
</pallas_src>

<mosaic_0001>
module attributes {stable_mosaic.version = 11 : i64} {
  func.func @_pairwise_kernel(%arg0: i32, %arg1: memref<128x32xf32, #tpu.memory_space<vmem>>, %arg2: memref<128x32xf32, #tpu.memory_space<vmem>>, %arg3: memref<128x150xbf16, #tpu.memory_space<vmem>>, %arg4: memref<1x150xf32, #tpu.memory_space<vmem>>, %arg5: memref<1x150xf32, #tpu.memory_space<vmem>>, %arg6: memref<1x1xf32, #tpu.memory_space<vmem>>, %arg7: memref<1x1xf32, #tpu.memory_space<vmem>>, %arg8: memref<128x1xf32, #tpu.memory_space<vmem>>) attributes {dimension_semantics = [#tpu.dimension_semantics<parallel>], iteration_bounds = array<i64: 2>, scalar_prefetch = 0 : i64, scratch_operands = 0 : i64, tpu.core_type = #tpu.core_type<tc>, window_params = [{transform_indices = @transform_0, window_bounds = array<i64: 128, 32>}, {transform_indices = @transform_1, window_bounds = array<i64: 128, 32>}, {pipeline_mode = #tpu.pipeline_mode<synchronous>, transform_indices = @transform_2, window_bounds = array<i64: 128, 150>}, {pipeline_mode = #tpu.pipeline_mode<synchronous>, transform_indices = @transform_3, window_bounds = array<i64: 1, 150>}, {pipeline_mode = #tpu.pipeline_mode<synchronous>, transform_indices = @transform_4, window_bounds = array<i64: 1, 150>}, {pipeline_mode = #tpu.pipeline_mode<synchronous>, transform_indices = @transform_5, window_bounds = array<i64: 1, 1>}, {pipeline_mode = #tpu.pipeline_mode<synchronous>, transform_indices = @transform_6, window_bounds = array<i64: 1, 1>}, {transform_indices = @transform_7, window_bounds = array<i64: 128, 1>}]} {
    %c0 = arith.constant 0 : index
    %c0_0 = arith.constant 0 : index
    %0 = vector.load %arg1[%c0, %c0_0] : memref<128x32xf32, #tpu.memory_space<vmem>>, vector<128x32xf32>
    %c0_1 = arith.constant 0 : index
    %c0_2 = arith.constant 0 : index
    %1 = vector.load %arg2[%c0_1, %c0_2] : memref<128x32xf32, #tpu.memory_space<vmem>>, vector<128x32xf32>
    %c0_3 = arith.constant 0 : index
    %c0_4 = arith.constant 0 : index
    %2 = vector.load %arg3[%c0_3, %c0_4] : memref<128x150xbf16, #tpu.memory_space<vmem>>, vector<128x150xbf16>
    %c0_5 = arith.constant 0 : index
    %c0_6 = arith.constant 0 : index
    %3 = vector.load %arg4[%c0_5, %c0_6] : memref<1x150xf32, #tpu.memory_space<vmem>>, vector<1x150xf32>
    %c0_7 = arith.constant 0 : index
    %c0_8 = arith.constant 0 : index
    %4 = vector.load %arg5[%c0_7, %c0_8] : memref<1x150xf32, #tpu.memory_space<vmem>>, vector<1x150xf32>
    %c0_9 = arith.constant 0 : index
    %c0_10 = arith.constant 0 : index
    %5 = vector.load %arg6[%c0_9, %c0_10] : memref<1x1xf32, #tpu.memory_space<vmem>>, vector<1x1xf32>
    %c0_11 = arith.constant 0 : index
    %c0_12 = arith.constant 0 : index
    %6 = vector.load %arg7[%c0_11, %c0_12] : memref<1x1xf32, #tpu.memory_space<vmem>>, vector<1x1xf32>
    %7 = arith.subf %0, %1 : vector<128x32xf32>
    %8 = arith.mulf %0, %1 : vector<128x32xf32>
    %9 = tpu.concatenate %0, %1, %7, %8 in 1 : vector<128x32xf32>, vector<128x32xf32>, vector<128x32xf32>, vector<128x32xf32> -> vector<128x128xf32>
    %10 = arith.truncf %9 : vector<128x128xf32> to vector<128x128xbf16>
    %cst = arith.constant dense<0.000000e+00> : vector<128x150xf32>
    %11 = tpu.matmul %10, %2, %cst {dimension_numbers = #tpu.dot_dimension_numbers<[1], [0], [0], [1], [0, 0, 1, 1], [], []>} : vector<128x128xbf16>, vector<128x150xbf16>, vector<128x150xf32> -> vector<128x150xf32>
    %12 = vector.broadcast %3 : vector<1x150xf32> to vector<128x150xf32>
    %13 = arith.addf %11, %12 : vector<128x150xf32>
    %cst_13 = arith.constant 0.000000e+00 : f32
    %14 = vector.broadcast %cst_13 : f32 to vector<128x150xf32>
    %15 = arith.maximumf %13, %14 : vector<128x150xf32>
    %cst_14 = arith.constant dense<0.000000e+00> : vector<128xf32>
    %16 = vector.multi_reduction <add>, %15, %cst_14 [1] : vector<128x150xf32> to vector<128xf32>
    %17 = vector.shape_cast %16 : vector<128xf32> to vector<128x1xf32>
    %cst_15 = arith.constant 1.500000e+02 : f32
    %18 = vector.broadcast %cst_15 : f32 to vector<128x1xf32>
    %19 = arith.divf %17, %18 : vector<128x1xf32>
    %20 = arith.mulf %15, %15 : vector<128x150xf32>
    %cst_16 = arith.constant dense<0.000000e+00> : vector<128xf32>
    %21 = vector.multi_reduction <add>, %20, %cst_16 [1] : vector<128x150xf32> to vector<128xf32>
    %22 = vector.shape_cast %21 : vector<128xf32> to vector<128x1xf32>
    %cst_17 = arith.constant 1.500000e+02 : f32
    %23 = vector.broadcast %cst_17 : f32 to vector<128x1xf32>
    %24 = arith.divf %22, %23 : vector<128x1xf32>
    %25 = arith.mulf %19, %19 : vector<128x1xf32>
    %26 = arith.subf %24, %25 : vector<128x1xf32>
    %cst_18 = arith.constant 0.000000e+00 : f32
    %27 = vector.broadcast %cst_18 : f32 to vector<128x1xf32>
    %28 = arith.maximumf %26, %27 : vector<128x1xf32>
    %cst_19 = arith.constant 9.99999974E-6 : f32
    %29 = vector.broadcast %cst_19 : f32 to vector<128x1xf32>
    %30 = arith.addf %28, %29 : vector<128x1xf32>
    %31 = math.rsqrt %30 : vector<128x1xf32>
    %32 = vector.broadcast %4 : vector<1x150xf32> to vector<128x150xf32>
    %33 = arith.mulf %15, %32 : vector<128x150xf32>
    %cst_20 = arith.constant dense<0.000000e+00> : vector<128xf32>
    %34 = vector.multi_reduction <add>, %33, %cst_20 [1] : vector<128x150xf32> to vector<128xf32>
    %35 = vector.shape_cast %34 : vector<128xf32> to vector<128x1xf32>
    %36 = vector.broadcast %5 : vector<1x1xf32> to vector<128x1xf32>
    %37 = arith.mulf %19, %36 : vector<128x1xf32>
    %38 = arith.subf %35, %37 : vector<128x1xf32>
    %39 = arith.mulf %31, %38 : vector<128x1xf32>
    %40 = vector.broadcast %6 : vector<1x1xf32> to vector<128x1xf32>
    %41 = arith.addf %39, %40 : vector<128x1xf32>
    %c0_21 = arith.constant 0 : index
    %c0_22 = arith.constant 0 : index
    %42 = vector.load %arg8[%c0_21, %c0_22] : memref<128x1xf32, #tpu.memory_space<vmem>>, vector<128x1xf32>
    tpu.vector_store %arg8[%c0_21, %c0_22], %41 {strides = array<i32>} : memref<128x1xf32, #tpu.memory_space<vmem>>, vector<128x1xf32>,
    return
  }
  func.func @transform_0(%arg0: i32) -> (i32, i32) {
    %c0_i32 = arith.constant 0 : i32
    %c0_i32_0 = arith.constant 0 : i32
    return %arg0, %c0_i32 : i32, i32
  }
  func.func @transform_1(%arg0: i32) -> (i32, i32) {
    %c0_i32 = arith.constant 0 : i32
    %c0_i32_0 = arith.constant 0 : i32
    return %arg0, %c0_i32 : i32, i32
  }
  func.func @transform_2(%arg0: i32) -> (i32, i32) {
    %c0_i32 = arith.constant 0 : i32
    %c0_i32_0 = arith.constant 0 : i32
    %c0_i32_1 = arith.constant 0 : i32
    return %c0_i32, %c0_i32_0 : i32, i32
  }
  func.func @transform_3(%arg0: i32) -> (i32, i32) {
    %c0_i32 = arith.constant 0 : i32
    %c0_i32_0 = arith.constant 0 : i32
    %c0_i32_1 = arith.constant 0 : i32
    return %c0_i32, %c0_i32_0 : i32, i32
  }
  func.func @transform_4(%arg0: i32) -> (i32, i32) {
    %c0_i32 = arith.constant 0 : i32
    %c0_i32_0 = arith.constant 0 : i32
    %c0_i32_1 = arith.constant 0 : i32
    return %c0_i32, %c0_i32_0 : i32, i32
  }
  func.func @transform_5(%arg0: i32) -> (i32, i32) {
    %c0_i32 = arith.constant 0 : i32
    %c0_i32_0 = arith.constant 0 : i32
    %c0_i32_1 = arith.constant 0 : i32
    return %c0_i32, %c0_i32_0 : i32, i32
  }
  func.func @transform_6(%arg0: i32) -> (i32, i32) {
    %c0_i32 = arith.constant 0 : i32
    %c0_i32_0 = arith.constant 0 : i32
    %c0_i32_1 = arith.constant 0 : i32
    return %c0_i32, %c0_i32_0 : i32, i32
  }
  func.func @transform_7(%arg0: i32) -> (i32, i32) {
    %c0_i32 = arith.constant 0 : i32
    %c0_i32_0 = arith.constant 0 : i32
    return %arg0, %c0_i32 : i32, i32
  }
}

</mosaic_0001>

<bundles_post_ra>
// kernel: pairwise_scorer.1
= control target key start
LH: loop header
LB: loop body
LE: loop exit
PB: predicated region body
PF: predicated region fallthrough
CT: control target
= control target key end

     0   :  { %s1715_s28 = smov 0   ;;  %s2397_s0 = inlined_call_operand.vmem [shape: f32[256,32], index: 0, kind: input, shape index: {}]   ;;  %s2398_s1 = inlined_call_operand.vmem [shape: f32[256,32], index: 1, kind: input, shape index: {}]   ;;  %s2399_s2 = inlined_call_operand.vmem [shape: bf16[128,150], index: 2, kind: input, shape index: {}]   ;;  %s2400_s3 = inlined_call_operand.vmem [shape: f32[1,150], index: 3, kind: input, shape index: {}]   ;;  %s2401_s4 = inlined_call_operand.vmem [shape: f32[1,150], index: 4, kind: input, shape index: {}]   ;;  %s2402_s5 = inlined_call_operand.<no memory space> [shape: f32[1,1], index: 5, kind: input, shape index: {}]   ;;  %s2403_s7 = inlined_call_operand.vmem [shape: f32[256,1], index: 7, kind: output, shape index: {}]   ;;  %s2404_s6 = inlined_call_operand.<no memory space> [shape: f32[1,1], index: 6, kind: input, shape index: {}]  }
   0x1   :  { %v12_v0 = vstv %s2402_s5  ;;  %v14_v1 = vstv %s2404_s6 }
   0x2   :  { %13 = vst [vmem:[#allocation2] sm:$0x1] %v12_v0  ;;  %15 = vst [vmem:[#allocation3] sm:$0x1] %v14_v1 }
   0x3 LB: > { %s1422_s29 = sadd.s32 4294967295, %s1663_s28   ;;  %p1426_p0 = scmp.ge.s32.totalorder %s1663_s28, 1  ;;  %s1663_s28 = sphi %s1715_s28, %s21_s28  }
   0x4   : > { %p253_p1 = scmp.lt.s32.totalorder %s1663_s28, 3 }
   0x6   : > { %p254_p2 = pnand %p1426_p0, %p253_p1 }
   0x7   : > { %s1427_s5 = sshll.u32 (!%p254_p2), %s1422_s29, 4  ;;  %v1601_v2 = vld [vmem:[%s2399_s2 + $0x4] ss:$8 sps:$4 sm:$0xff] (!%p254_p2)   ;;  %v1603_v3 = vld [vmem:[%s2399_s2] ss:$8 sps:$4 sm:$0xff] (!%p254_p2)   ;;  %s1665_s25 = smov (!%p254_p2), 32  }
   0x8   : > { %257 = sbr.rel (%p254_p2) target bundleno = 616 (0x268), region = 48  ;;  %p291_p3 = scmp.lt.s32.totalorder (!%p254_p2), %s1427_s5, 31  ;;  %735 = vmatprep.subr.bf16.mxu0 (!%p254_p2), %v1601_v2  ;;  %1453 = vmatprep.subr.bf16.mxu1 (!%p254_p2), %v1601_v2  ;;  %v1604_v4 = vld [vmem:[%s2399_s2 + $0x14] ss:$8 sps:$4 sm:$0xff] (!%p254_p2)   ;;  %v1606_v5 = vld [vmem:[%s2399_s2 + $0x10] ss:$8 sps:$4 sm:$0xff] (!%p254_p2)  }
   0x9   : > { %736 = vmatpush1.bf16.msra.mxu0 (!%p254_p2), %v1603_v3  ;;  %1461 = vmatpush1.bf16.msra.mxu1 (!%p254_p2), %v1603_v3  ;;  %v1607_v6 = vld [vmem:[%s2399_s2 + $0x24] ss:$8 sps:$4 sm:$0xff] (!%p254_p2)   ;;  %v1609_v7 = vld [vmem:[%s2399_s2 + $0x20] ss:$8 sps:$4 sm:$0xff] (!%p254_p2)   ;;  %v1610_v25 = vld [vmem:[%s2399_s2 + $0x34] ss:$8 sps:$4 sm:$0xff] (!%p254_p2)  }
   0xa   : > { %737 = vmatprep.subr.bf16.mxu0 (!%p254_p2), %v1604_v4  ;;  %1454 = vmatprep.subr.bf16.mxu1 (!%p254_p2), %v1604_v4  ;;  %v1612_v26 = vld [vmem:[%s2399_s2 + $0x30] ss:$8 sps:$4 sm:$0xff] (!%p254_p2)   ;;  %s1666_s30 = smov (!%p254_p2), 64   ;;  %v1613_v35 = vld [vmem:[%s2399_s2 + $0x44] ss:$8 sps:$4 sm:$0xff] (!%p254_p2)   ;;  %s1667_s9 = smov (!%p254_p2), 96  }
   0xb   : > { %v1615_v44 = vld [vmem:[%s2399_s2 + $0x40] ss:$8 sps:$4 sm:$0xff] (!%p254_p2)   ;;  %v1616_v45 = vld [vmem:[%s2399_s2 + $0x54] ss:$8 sps:$4 sm:$0xff] (!%p254_p2)   ;;  %v1618_v52 = vld [vmem:[%s2399_s2 + $0x50] ss:$8 sps:$4 sm:$0xff] (!%p254_p2)  }
   0xc   : > { %v1619_v53 = vld [vmem:[%s2399_s2 + $0x64] ss:$8 sps:$4 sm:$0xff] (!%p254_p2)   ;;  %v1668_v60 = vmov (!%p254_p2), 0   ;;  %v1621_v63 = vld [vmem:[%s2399_s2 + $0x60] ss:$8 sps:$4 sm:$0xff] (!%p254_p2)   ;;  %vm585_vm0 = vcmask (!%p254_p2), 261120  }
   0xd   : > { %738 = vmatpush1.bf16.msra.mxu0 (!%p254_p2), %v1606_v5  ;;  %1462 = vmatpush1.bf16.msra.mxu1 (!%p254_p2), %v1606_v5  ;;  %v1622_v0 = vld [vmem:[%s2399_s2 + $0x74] ss:$8 sps:$4 sm:$0xff] (!%p254_p2)   ;;  %vm602_vm1 = vcmask (!%p254_p2), 523264   ;;  %vm619_vm2 = vcmask (!%p254_p2), 785408   ;;  %vm880_vm3 = vcmask (!%p254_p2), 179200   ;;  %vm1337_vm4 = vcmask (!%p254_p2), 7168  }
   0xe   : > { %739 = vmatprep.subr.bf16.mxu0 (!%p254_p2), %v1607_v6  ;;  %1455 = vmatprep.subr.bf16.mxu1 (!%p254_p2), %v1607_v6 }
   0xf   : > { %s2406_s5 = smov (!%p291_p3, %s1427_s5), 31  ;;  %767 = vmatprep.mubr.bf16.mxu0 %v1668_v60  ;;  %807 = vmatprep.mubr.bf16.mxu1 %v1668_v60 }
  0x10   : > { %s1738_s16 = sshll.u32 %s2406_s5, 3 }
  0x11   : > { %s1744_s19 = scalar_lea.vmem %s2398_s1, %s1738_s16  ;;  %s1755_s24 = scalar_lea.vmem %s2397_s0, %s1738_s16  ;;  %740 = vmatpush1.bf16.msra.mxu0 %v1609_v7  ;;  %1463 = vmatpush1.bf16.msra.mxu1 %v1609_v7 }
  0x12   : > { %v325_v8 = vld [vmem:[%s1744_s19] sm:$0xff]  ;;  %v326_v9 = vld [vmem:[%s1744_s19 + $0x8] sm:$0xff]  ;;  %v327_v31 = vld [vmem:[%s1744_s19 + $0x10] sm:$0xff]  ;;  %741 = vmatprep.subr.bf16.mxu0 %v1610_v25  ;;  %1456 = vmatprep.subr.bf16.mxu1 %v1610_v25  ;;  %s2270_s6 = scalar_lea.vmem %s2403_s7, %s1738_s16 }
  0x13   : > { %v333_v10 = vld [vmem:[%s1744_s19 + $0x40] sm:$0xff]  ;;  %v1481_v11 = vpack.i.bf16 %v326_v9, %v325_v8  ;;  %v1762_v13 = vld [vmem:[%s1755_s24 + $0x8] sm:$0xff]  ;;  %v328_v32 = vld [vmem:[%s1744_s19 + $0x18] sm:$0xff] }
  0x14   : > { %v1759_v12 = vld [vmem:[%s1755_s24] sm:$0xff]  ;;  %v334_v14 = vld [vmem:[%s1744_s19 + $0x48] sm:$0xff]  ;;  %v362_v16 = vsub.f32 %v1762_v13, %v326_v9  ;;  %v378_v23 = vmul.f32 %v326_v9, %v1762_v13  ;;  %v1791_v33 = vld [vmem:[%s1755_s24 + $0x10] sm:$0xff]  ;;  %v1506_v39 = vpack.i.bf16 %v328_v32, %v327_v31 }
  0x15   : > { %v361_v15 = vsub.f32 %v1759_v12, %v325_v8  ;;  %v1486_v17 = vpack.i.bf16 %v334_v14, %v333_v10  ;;  %v1768_v18 = vld [vmem:[%s1755_s24 + $0x40] sm:$0xff]  ;;  %v1771_v19 = vld [vmem:[%s1755_s24 + $0x48] sm:$0xff]  ;;  %1482 = vrot.lane.b32.xlu0 %v1481_v11, %s1665_s25  ;;  %v377_v22 = vmul.f32 %v325_v8, %v1759_v12  ;;  %v1794_v34 = vld [vmem:[%s1755_s24 + $0x18] sm:$0xff]  ;;  %742 = vmatpush1.bf16.msra.mxu0 %v1612_v26 }
  0x16   : > { %v369_v20 = vsub.f32 %v1768_v18, %v333_v10  ;;  %v370_v21 = vsub.f32 %v1771_v19, %v334_v14  ;;  %v385_v28 = vmul.f32 %v333_v10, %v1768_v18  ;;  %v386_v29 = vmul.f32 %v334_v14, %v1771_v19  ;;  %v335_v37 = vld [vmem:[%s1744_s19 + $0x50] sm:$0xff]  ;;  %v336_v38 = vld [vmem:[%s1744_s19 + $0x58] sm:$0xff]  ;;  %1464 = vmatpush1.bf16.msra.mxu1 %v1612_v26  ;;  %v329_v58 = vld [vmem:[%s1744_s19 + $0x20] sm:$0xff] }
  0x17   : > { %v1491_v24 = vpack.i.bf16 %v362_v16, %v361_v15  ;;  %v1501_v30 = vpack.i.bf16 %v378_v23, %v377_v22  ;;  %v363_v40 = vsub.f32 %v1791_v33, %v327_v31  ;;  %v364_v41 = vsub.f32 %v1794_v34, %v328_v32  ;;  %v1806_v42 = vld [vmem:[%s1755_s24 + $0x50] sm:$0xff]  ;;  %v1809_v43 = vld [vmem:[%s1755_s24 + $0x58] sm:$0xff]  ;;  %743 = vmatprep.subr.bf16.mxu0 %v1613_v35  ;;  %v330_v59 = vld [vmem:[%s1744_s19 + $0x28] sm:$0xff] }
  0x18   : > { %v1496_v27 = vpack.i.bf16 %v370_v21, %v369_v20  ;;  %v1511_v36 = vpack.i.bf16 %v386_v29, %v385_v28  ;;  %v1516_v46 = vpack.i.bf16 %v336_v38, %v335_v37  ;;  %v371_v47 = vsub.f32 %v1806_v42, %v335_v37  ;;  %1457 = vmatprep.subr.bf16.mxu1 %v1613_v35  ;;  %v1837_v61 = vld [vmem:[%s1755_s24 + $0x20] sm:$0xff]  ;;  %v1840_v62 = vld [vmem:[%s1755_s24 + $0x28] sm:$0xff]  ;;  %v1624_v9 = vld [vmem:[%s2399_s2 + $0x70] ss:$8 sps:$4 sm:$0xff]  }
  0x19   : > { %1492 = vrot.lane.b32.xlu1 %v1491_v24, %s1666_s30  ;;  %1487 = vrot.lane.b32.xlu0 %v1486_v17, %s1665_s25  ;;  %v372_v48 = vsub.f32 %v1809_v43, %v336_v38  ;;  %v1521_v49 = vpack.i.bf16 %v364_v41, %v363_v40  ;;  %v379_v50 = vmul.f32 %v327_v31, %v1791_v33  ;;  %v337_v2 = vld [vmem:[%s1744_s19 + $0x60] sm:$0xff]  ;;  %v338_v6 = vld [vmem:[%s1744_s19 + $0x68] sm:$0xff] }
  0x1a   : > { %v380_v51 = vmul.f32 %v328_v32, %v1794_v34  ;;  %744 = vmatpush1.bf16.msra.mxu0 %v1615_v44  ;;  %1465 = vmatpush1.bf16.msra.mxu1 %v1615_v44  ;;  %v387_v55 = vmul.f32 %v335_v37, %v1806_v42  ;;  %v388_v56 = vmul.f32 %v336_v38, %v1809_v43  ;;  %v1856_v7 = vld [vmem:[%s1755_s24 + $0x60] sm:$0xff]  ;;  %v1859_v8 = vld [vmem:[%s1755_s24 + $0x68] sm:$0xff]  ;;  %v331_v24 = vld [vmem:[%s1744_s19 + $0x30] sm:$0xff] }
  0x1b   : > { %745 = vmatprep.subr.bf16.mxu0 %v1616_v45  ;;  %v1526_v54 = vpack.i.bf16 %v372_v48, %v371_v47  ;;  %1458 = vmatprep.subr.bf16.mxu1 %v1616_v45  ;;  %v1541_v3 = vpack.i.bf16 %v330_v59, %v329_v58  ;;  %v365_v4 = vsub.f32 %v1837_v61, %v329_v58  ;;  %v332_v25 = vld [vmem:[%s1744_s19 + $0x38] sm:$0xff]  ;;  %v1877_v26 = vld [vmem:[%s1755_s24 + $0x30] sm:$0xff] }
  0x1c   : > { %v1531_v57 = vpack.i.bf16 %v380_v51, %v379_v50  ;;  %v1536_v1 = vpack.i.bf16 %v388_v56, %v387_v55  ;;  %v366_v5 = vsub.f32 %v1840_v62, %v330_v59  ;;  %v1546_v10 = vpack.i.bf16 %v338_v6, %v337_v2  ;;  %v339_v29 = vld [vmem:[%s1744_s19 + $0x70] sm:$0xff]  ;;  %v340_v35 = vld [vmem:[%s1744_s19 + $0x78] sm:$0xff] }
  0x1d   : > { %1497 = vrot.lane.b32.xlu1 %v1496_v27, %s1666_s30  ;;  %1502 = vrot.lane.b32.xlu0 %v1501_v30, %s1667_s9  ;;  %v373_v11 = vsub.f32 %v1856_v7, %v337_v2  ;;  %v374_v14 = vsub.f32 %v1859_v8, %v338_v6  ;;  %v381_v16 = vmul.f32 %v329_v58, %v1837_v61  ;;  %v1880_v27 = vld [vmem:[%s1755_s24 + $0x38] sm:$0xff] }
  0x1e   : > { %746 = vmatpush1.bf16.msra.mxu0 %v1618_v52  ;;  %1466 = vmatpush1.bf16.msra.mxu1 %v1618_v52  ;;  %v1551_v15 = vpack.i.bf16 %v366_v5, %v365_v4  ;;  %v382_v17 = vmul.f32 %v330_v59, %v1840_v62  ;;  %v389_v21 = vmul.f32 %v337_v2, %v1856_v7  ;;  %v1892_v37 = vld [vmem:[%s1755_s24 + $0x78] sm:$0xff] }
  0x1f   : > { %747 = vmatprep.subr.bf16.mxu0 %v1619_v53  ;;  %1459 = vmatprep.subr.bf16.mxu1 %v1619_v53  ;;  %v1556_v20 = vpack.i.bf16 %v374_v14, %v373_v11  ;;  %v390_v22 = vmul.f32 %v338_v6, %v1859_v8  ;;  %v1571_v30 = vpack.i.bf16 %v332_v25, %v331_v24 }
  0x20   : > { %v1561_v23 = vpack.i.bf16 %v382_v17, %v381_v16  ;;  %v367_v31 = vsub.f32 %v1877_v26, %v331_v24  ;;  %v368_v32 = vsub.f32 %v1880_v27, %v332_v25  ;;  %v1576_v38 = vpack.i.bf16 %v340_v35, %v339_v29 }
  0x21   : > { %1512 = vrot.lane.b32.xlu1 %v1511_v36, %s1667_s9  ;;  %1507 = vrot.lane.b32.xlu0 %v1506_v39, %s1665_s25  ;;  %v1566_v28 = vpack.i.bf16 %v390_v22, %v389_v21  ;;  %v1889_v36 = vld [vmem:[%s1755_s24 + $0x70] sm:$0xff]  ;;  %v376_v40 = vsub.f32 %v1892_v37, %v340_v35  ;;  %v383_v44 = vmul.f32 %v331_v24, %v1877_v26 }
  0x22   : > { %748 = vmatpush1.bf16.msra.mxu0 %v1621_v63  ;;  %1467 = vmatpush1.bf16.msra.mxu1 %v1621_v63  ;;  %v375_v39 = vsub.f32 %v1889_v36, %v339_v29  ;;  %v1581_v41 = vpack.i.bf16 %v368_v32, %v367_v31  ;;  %v384_v45 = vmul.f32 %v332_v25, %v1880_v27 }
  0x23   : > { %749 = vmatprep.subr.bf16.mxu0 %v1622_v0  ;;  %1460 = vmatprep.subr.bf16.mxu1 %v1622_v0  ;;  %v391_v47 = vmul.f32 %v339_v29, %v1889_v36  ;;  %v392_v48 = vmul.f32 %v340_v35, %v1892_v37 }
  0x25   : > { %1517 = vrot.lane.b32.xlu1 %v1516_v46, %s1665_s25  ;;  %1522 = vrot.lane.b32.xlu0 %v1521_v49, %s1666_s30  ;;  %v1586_v46 = vpack.i.bf16 %v376_v40, %v375_v39  ;;  %v1591_v49 = vpack.i.bf16 %v384_v45, %v383_v44  ;;  %v1596_v50 = vpack.i.bf16 %v392_v48, %v391_v47 }
  0x26   : > { %750 = vmatpush1.bf16.msra.mxu0 %v1624_v9  ;;  %1468 = vmatpush1.bf16.msra.mxu1 %v1624_v9 }
  0x29   : > { %1527 = vrot.lane.b32.xlu1 %v1526_v54, %s1666_s30  ;;  %1532 = vrot.lane.b32.xlu0 %v1531_v57, %s1667_s9 }
  0x2d   : > { %1537 = vrot.lane.b32.xlu1 %v1536_v1, %s1667_s9  ;;  %1542 = vrot.lane.b32.xlu0 %v1541_v3, %s1665_s25 }
  0x31   : > { %1547 = vrot.lane.b32.xlu1 %v1546_v10, %s1665_s25  ;;  %1552 = vrot.lane.b32.xlu0 %v1551_v15, %s1666_s30 }
  0x35   : > { %1557 = vrot.lane.b32.xlu1 %v1556_v20, %s1666_s30  ;;  %1562 = vrot.lane.b32.xlu0 %v1561_v23, %s1667_s9 }
  0x39   : > { %1567 = vrot.lane.b32.xlu1 %v1566_v28, %s1667_s9  ;;  %1572 = vrot.lane.b32.xlu0 %v1571_v30, %s1665_s25 }
  0x3d   : > { %1577 = vrot.lane.b32.xlu1 %v1576_v38, %s1665_s25  ;;  %1582 = vrot.lane.b32.xlu0 %v1581_v41, %s1666_s30 }
  0x41   : > { %1587 = vrot.lane.b32.xlu1 %v1586_v46, %s1666_s30  ;;  %1592 = vrot.lane.b32.xlu0 %v1591_v49, %s1667_s9 }
  0x45   : > { %1597 = vrot.lane.b32.xlu1 %v1596_v50, %s1667_s9 }
  0x87   : > { %v1483_v51 = vpop.permute.xlu0 %1482 }
  0x88   : > { %v1485_v52 = vunpack.i.h.bf16 %v1483_v51  ;;  %v1484_v53 = vunpack.i.l.bf16 %v1483_v51 }
  0x8a   : > { %v586_v63 = vsel %vm585_vm0, %v1759_v12, %v1484_v53  ;;  %v587_v0 = vsel %vm585_vm0, %v1762_v13, %v1485_v52 }
  0x8b   : > { %v1493_v54 = vpop.permute.xlu1 %1492  ;;  %v1488_v55 = vpop.permute.xlu0 %1487 }
  0x8c   : > { %v1495_v56 = vunpack.i.h.bf16 %v1493_v54  ;;  %v1494_v57 = vunpack.i.l.bf16 %v1493_v54  ;;  %v1490_v58 = vunpack.i.h.bf16 %v1488_v55  ;;  %v1489_v59 = vunpack.i.l.bf16 %v1488_v55 }
  0x8e   : > { %v604_v9 = vsel %vm602_vm1, %v587_v0, %v1495_v56  ;;  %v603_v10 = vsel %vm602_vm1, %v586_v63, %v1494_v57  ;;  %v594_v11 = vsel %vm585_vm0, %v1768_v18, %v1489_v59  ;;  %v595_v12 = vsel %vm585_vm0, %v1771_v19, %v1490_v58 }
  0x8f   : > { %v1498_v1 = vpop.permute.xlu1 %1497  ;;  %v1503_v2 = vpop.permute.xlu0 %1502 }
  0x90   : > { %v1500_v3 = vunpack.i.h.bf16 %v1498_v1  ;;  %v1499_v4 = vunpack.i.l.bf16 %v1498_v1  ;;  %v1505_v5 = vunpack.i.h.bf16 %v1503_v2  ;;  %v1504_v6 = vunpack.i.l.bf16 %v1503_v2 }
  0x92   : > { %v620_v13 = vsel %vm619_vm2, %v603_v10, %v1504_v6  ;;  %v621_v15 = vsel %vm619_vm2, %v604_v9, %v1505_v5  ;;  %v612_v22 = vsel %vm602_vm1, %v595_v12, %v1500_v3  ;;  %v611_v23 = vsel %vm602_vm1, %v594_v11, %v1499_v4 }
  0x93   : > { %v1513_v14 = vpop.permute.xlu1 %1512  ;;  %v1508_v20 = vpop.permute.xlu0 %1507  ;;  %v636_v21 = vpack.c.bf16 %v621_v15, %v620_v13 }
  0x94   : > { %v1515_v16 = vunpack.i.h.bf16 %v1513_v14  ;;  %v1514_v17 = vunpack.i.l.bf16 %v1513_v14  ;;  %v1510_v24 = vunpack.i.h.bf16 %v1508_v20  ;;  %v1509_v25 = vunpack.i.l.bf16 %v1508_v20 }
  0x95   : > { %768 = vmatmul.mubr.bf16.vlgmr.msra.gmra.mrb[0].mxu0 %v636_v21 }
  0x96   : > { %v628_v18 = vsel %vm619_vm2, %v611_v23, %v1514_v17  ;;  %v629_v19 = vsel %vm619_vm2, %v612_v22, %v1515_v16  ;;  %777 = vmatprep.mubr.bf16.mxu0 %v1668_v60  ;;  %v589_v35 = vsel %vm585_vm0, %v1794_v34, %v1510_v24  ;;  %v588_v38 = vsel %vm585_vm0, %v1791_v33, %v1509_v25 }
  0x97   : > { %v1518_v28 = vpop.permute.xlu1 %1517  ;;  %v640_v29 = vpack.c.bf16 %v629_v19, %v628_v18  ;;  %v1523_v30 = vpop.permute.xlu0 %1522 }
  0x98   : > { %v1520_v31 = vunpack.i.h.bf16 %v1518_v28  ;;  %v1519_v32 = vunpack.i.l.bf16 %v1518_v28  ;;  %v1525_v39 = vunpack.i.h.bf16 %v1523_v30  ;;  %v1524_v40 = vunpack.i.l.bf16 %v1523_v30 }
  0x99   : > { %808 = vmatmul.mubr.bf16.vlgmr.msra.gmra.mrb[0].mxu1 %v640_v29 }
  0x9a   : > { %817 = vmatprep.mubr.bf16.mxu1 %v1668_v60  ;;  %v597_v41 = vsel %vm585_vm0, %v1809_v43, %v1520_v31  ;;  %v596_v44 = vsel %vm585_vm0, %v1806_v42, %v1519_v32  ;;  %v605_v46 = vsel %vm602_vm1, %v588_v38, %v1524_v40  ;;  %v606_v47 = vsel %vm602_vm1, %v589_v35, %v1525_v39 }
  0x9b   : > { %v1528_v45 = vpop.permute.xlu1 %1527  ;;  %v1533_v34 = vpop.permute.xlu0 %1532 }
  0x9c   : > { %v1530_v48 = vunpack.i.h.bf16 %v1528_v45  ;;  %v1529_v49 = vunpack.i.l.bf16 %v1528_v45  ;;  %v1535_v33 = vunpack.i.h.bf16 %v1533_v34  ;;  %v1534_v50 = vunpack.i.l.bf16 %v1533_v34 }
  0x9e   : > { %v613_v51 = vsel %vm602_vm1, %v596_v44, %v1529_v49  ;;  %v614_v52 = vsel %vm602_vm1, %v597_v41, %v1530_v48  ;;  %v622_v43 = vsel %vm619_vm2, %v605_v46, %v1534_v50  ;;  %v623_v54 = vsel %vm619_vm2, %v606_v47, %v1535_v33 }
  0x9f   : > { %v1538_v53 = vpop.permute.xlu1 %1537  ;;  %v637_v56 = vpack.c.bf16 %v623_v54, %v622_v43  ;;  %v1543_v57 = vpop.permute.xlu0 %1542 }
  0xa0   : > { %v1540_v42 = vunpack.i.h.bf16 %v1538_v53  ;;  %v1539_v55 = vunpack.i.l.bf16 %v1538_v53  ;;  %v1545_v58 = vunpack.i.h.bf16 %v1543_v57  ;;  %v1544_v59 = vunpack.i.l.bf16 %v1543_v57 }
  0xa1   : > { %778 = vmatmul.mubr.bf16.gmra.mrb[4].mxu0 %v637_v56 }
  0xa2   : > { %v630_v63 = vsel %vm619_vm2, %v613_v51, %v1539_v55  ;;  %v631_v0 = vsel %vm619_vm2, %v614_v52, %v1540_v42  ;;  %787 = vmatprep.mubr.bf16.mxu0 %v1668_v60  ;;  %v591_v6 = vsel %vm585_vm0, %v1840_v62, %v1545_v58  ;;  %v590_v9 = vsel %vm585_vm0, %v1837_v61, %v1544_v59 }
  0xa3   : > { %v641_v1 = vpack.c.bf16 %v631_v0, %v630_v63  ;;  %v1548_v2 = vpop.permute.xlu1 %1547  ;;  %v1553_v3 = vpop.permute.xlu0 %1552  ;;  %v645_v63 = vlaneseq }
  0xa4   : > { %v1550_v4 = vunpack.i.h.bf16 %v1548_v2  ;;  %v1549_v5 = vunpack.i.l.bf16 %v1548_v2  ;;  %v1555_v10 = vunpack.i.h.bf16 %v1553_v3  ;;  %v1554_v11 = vunpack.i.l.bf16 %v1553_v3  ;;  %v357_v2 = vld [vmem:[%s2400_s3] sm:$0x3] }
  0xa5   : > { %818 = vmatmul.mubr.bf16.gmra.mrb[4].mxu1 %v641_v1  ;;  %v646_v0 = vshrl.u32 %v645_v63, 7 }
  0xa6   : > { %827 = vmatprep.mubr.bf16.mxu1 %v1668_v60  ;;  %v599_v12 = vsel %vm585_vm0, %v1859_v8, %v1550_v4  ;;  %v598_v14 = vsel %vm585_vm0, %v1856_v7, %v1549_v5  ;;  %v607_v15 = vsel %vm602_vm1, %v590_v9, %v1554_v11  ;;  %v608_v16 = vsel %vm602_vm1, %v591_v6, %v1555_v10  ;;  %v358_v6 = vld [vmem:[%s2401_s4] sm:$0x3] }
  0xa7   : > { %v1558_v13 = vpop.permute.xlu1 %1557  ;;  %v1563_v17 = vpop.permute.xlu0 %1562  ;;  %v647_v1 = vsub.s32 0, %v646_v0  ;;  %v651_v3 = vsub.s32 1, %v646_v0 }
  0xa8   : > { %v1560_v62 = vunpack.i.h.bf16 %v1558_v13  ;;  %v1559_v20 = vunpack.i.l.bf16 %v1558_v13  ;;  %v1565_v21 = vunpack.i.h.bf16 %v1563_v17  ;;  %v1564_v61 = vunpack.i.l.bf16 %v1563_v17 }
  0xa9   : > { %v1980_v4 = vrot.slane %v357_v2, %v647_v1  ;;  %v1982_v5 = vrot.slane %v357_v2, %v651_v3 }
  0xaa   : > { %v615_v22 = vsel %vm602_vm1, %v598_v14, %v1559_v20  ;;  %v616_v23 = vsel %vm602_vm1, %v599_v12, %v1560_v62  ;;  %v624_v8 = vsel %vm619_vm2, %v607_v15, %v1564_v61  ;;  %v625_v25 = vsel %vm619_vm2, %v608_v16, %v1565_v21 }
  0xab   : > { %v1568_v24 = vpop.permute.xlu1 %1567  ;;  %v638_v19 = vpack.c.bf16 %v625_v25, %v624_v8  ;;  %v1573_v28 = vpop.permute.xlu0 %1572  ;;  %v1988_v12 = vrot.slane %v358_v6, %v647_v1 }
  0xac   : > { %v1570_v7 = vunpack.i.h.bf16 %v1568_v24  ;;  %v1569_v18 = vunpack.i.l.bf16 %v1568_v24  ;;  %v1575_v29 = vunpack.i.h.bf16 %v1573_v28  ;;  %v1574_v30 = vunpack.i.l.bf16 %v1573_v28 }
  0xad   : > { %788 = vmatmul.mubr.bf16.gmra.mrb[8].mxu0 %v638_v19 }
  0xae   : > { %v632_v31 = vsel %vm619_vm2, %v615_v22, %v1569_v18  ;;  %v633_v32 = vsel %vm619_vm2, %v616_v23, %v1570_v7  ;;  %797 = vmatprep.mubr.bf16.mxu0 %v1668_v60  ;;  %v593_v44 = vsel %vm585_vm0, %v1880_v27, %v1575_v29  ;;  %v592_v45 = vsel %vm585_vm0, %v1877_v26, %v1574_v30 }
  0xaf   : > { %v642_v35 = vpack.c.bf16 %v633_v32, %v632_v31  ;;  %v1578_v38 = vpop.permute.xlu1 %1577  ;;  %v1583_v39 = vpop.permute.xlu0 %1582  ;;  %v1994_v23 = vrot.slane %v358_v6, %v651_v3 }
  0xb0   : > { %v1580_v40 = vunpack.i.h.bf16 %v1578_v38  ;;  %v1579_v41 = vunpack.i.l.bf16 %v1578_v38  ;;  %v1585_v46 = vunpack.i.h.bf16 %v1583_v39  ;;  %v1584_v47 = vunpack.i.l.bf16 %v1583_v39 }
  0xb1   : > { %828 = vmatmul.mubr.bf16.gmra.mrb[8].mxu1 %v642_v35 }
  0xb2   : > { %837 = vmatprep.mubr.bf16.mxu1 %v1668_v60  ;;  %v601_v34 = vsel %vm585_vm0, %v1892_v37, %v1580_v40  ;;  %v600_v48 = vsel %vm585_vm0, %v1889_v36, %v1579_v41  ;;  %v609_v33 = vsel %vm602_vm1, %v592_v45, %v1584_v47  ;;  %v610_v50 = vsel %vm602_vm1, %v593_v44, %v1585_v46 }
  0xb3   : > { %v1588_v49 = vpop.permute.xlu1 %1587  ;;  %v1593_v51 = vpop.permute.xlu0 %1592 }
  0xb4   : > { %v1590_v27 = vunpack.i.h.bf16 %v1588_v49  ;;  %v1589_v52 = vunpack.i.l.bf16 %v1588_v49  ;;  %v1595_v53 = vunpack.i.h.bf16 %v1593_v51  ;;  %v1594_v26 = vunpack.i.l.bf16 %v1593_v51 }
  0xb6   : > { %v617_v43 = vsel %vm602_vm1, %v600_v48, %v1589_v52  ;;  %v618_v60 = vsel %vm602_vm1, %v601_v34, %v1590_v27  ;;  %v626_v37 = vsel %vm619_vm2, %v609_v33, %v1594_v26  ;;  %v627_v42 = vsel %vm619_vm2, %v610_v50, %v1595_v53 }
  0xb7   : > { %v1598_v54 = vpop.permute.xlu1 %1597  ;;  %v639_v56 = vpack.c.bf16 %v627_v42, %v626_v37 }
  0xb8   : > { %v1600_v36 = vunpack.i.h.bf16 %v1598_v54  ;;  %v1599_v55 = vunpack.i.l.bf16 %v1598_v54 }
  0xb9   : > { %798 = vmatmul.mubr.bf16.gmra.mrb[12].mxu0 %v639_v56 }
  0xba   : > { %v634_v57 = vsel %vm619_vm2, %v617_v43, %v1599_v55  ;;  %v635_v58 = vsel %vm619_vm2, %v618_v60, %v1600_v36 }
  0xbb   : > { %v643_v59 = vpack.c.bf16 %v635_v58, %v634_v57 }
  0xbd   : > { %838 = vmatmul.mubr.bf16.gmra.mrb[12].mxu1 %v643_v59 }
 0x168   : > { %v769_v9 = vpop.f32.mrb[0].mxu0 }
 0x169   : > { %v770_v10 = vadd.f32 %v769_v9, %v1980_v4  ;;  %v771_v11 = vpop.f32.mrb[1].mxu0 }
 0x16a   : > { %v772_v14 = vadd.f32 %v771_v11, %v1982_v5  ;;  %v773_v13 = vpop.f32.mrb[2].mxu0 }
 0x16b   : > { %v848_v15 = vmax.f32 %v770_v10, 0.0  ;;  %v774_v16 = vadd.f32 %v773_v13, %v1980_v4  ;;  %v775_v62 = vpop.f32.mrb[3].mxu0 }
 0x16c   : > { %v809_v17 = vpop.f32.mrb[0].mxu1  ;;  %v849_v20 = vmax.f32 %v772_v14, 0.0  ;;  %v776_v61 = vadd.f32 %v775_v62, %v1982_v5 }
 0x16d   : > { %v810_v21 = vadd.f32 %v809_v17, %v1980_v4  ;;  %v811_v22 = vpop.f32.mrb[1].mxu1  ;;  %v850_v24 = vmax.f32 %v774_v16, 0.0  ;;  %v962_v7 = vmul.f32 %v848_v15, %v848_v15  ;;  %v1165_v18 = vmul.f32 %v1988_v12, %v848_v15 }
 0x16e   : > { %v812_v8 = vadd.f32 %v811_v22, %v1982_v5  ;;  %v813_v25 = vpop.f32.mrb[2].mxu1  ;;  %v851_v28 = vmax.f32 %v776_v61, 0.0  ;;  %v881_v31 = vsel %vm880_vm3, %v849_v20, 0.0  ;;  %v963_v45 = vmul.f32 %v849_v20, %v849_v20 }
 0x16f   : > { %v864_v19 = vmax.f32 %v810_v21, 0.0  ;;  %v814_v29 = vadd.f32 %v813_v25, %v1980_v4  ;;  %v815_v30 = vpop.f32.mrb[3].mxu1  ;;  %v882_v38 = vadd.f32 %v881_v31, %v848_v15  ;;  %v964_v39 = vmul.f32 %v850_v24, %v850_v24 }
 0x170   : > { %v2000_v32 = vmax.f32 %v812_v8, 0.0  ;;  %v816_v35 = vadd.f32 %v815_v30, %v1982_v5  ;;  %v885_v41 = vsel %vm880_vm3, %v851_v28, 0.0  ;;  %v965_v44 = vmul.f32 %v851_v28, %v851_v28 }
 0x171   : > { %v2003_v40 = vmax.f32 %v814_v29, 0.0  ;;  %883 = vadd.xlane.f32.xlu0 %v882_v38  ;;  %v886_v34 = vadd.f32 %v885_v41, %v850_v24  ;;  %v978_v48 = vmul.f32 %v864_v19, %v864_v19  ;;  %v994_v50 = vsel %vm880_vm3, %v963_v45, 0.0 }
 0x172   : > { %v2006_v46 = vmax.f32 %v816_v35, 0.0  ;;  %v913_v47 = vsel %vm880_vm3, %v2000_v32, 0.0  ;;  %v998_v33 = vsel %vm880_vm3, %v965_v44, 0.0  ;;  %v995_v53 = vadd.f32 %v994_v50, %v962_v7 }
 0x173   : > { %v914_v49 = vadd.f32 %v913_v47, %v864_v19  ;;  %v980_v51 = vmul.f32 %v2003_v40, %v2003_v40  ;;  %v999_v52 = vadd.f32 %v998_v33, %v964_v39  ;;  %v979_v54 = vmul.f32 %v2000_v32, %v2000_v32 }
 0x174   : > { %v917_v27 = vsel %vm880_vm3, %v2006_v46, 0.0  ;;  %v981_v26 = vmul.f32 %v2006_v46, %v2006_v46  ;;  %v779_v43 = vpop.f32.mrb[4].mxu0  ;;  %v1167_v37 = vmul.f32 %v1988_v12, %v850_v24  ;;  %v1168_v42 = vmul.f32 %v1994_v23, %v851_v28 }
 0x175   : > { %915 = vadd.xlane.f32.xlu1 %v914_v49  ;;  %v918_v60 = vadd.f32 %v917_v27, %v2003_v40  ;;  %v780_v36 = vadd.f32 %v779_v43, %v1980_v4  ;;  %v781_v55 = vpop.f32.mrb[5].mxu0  ;;  %v1166_v57 = vmul.f32 %v1994_v23, %v849_v20  ;;  %v2027_v58 = vmul.f32 %v1988_v12, %v864_v19 }
 0x176   : > { %v1030_v56 = vsel %vm880_vm3, %v981_v26, 0.0  ;;  %v782_v59 = vadd.f32 %v781_v55, %v1982_v5  ;;  %v783_v63 = vpop.f32.mrb[6].mxu0  ;;  %v1026_v1 = vsel %vm880_vm3, %v979_v54, 0.0  ;;  %v1201_v2 = vsel %vm880_vm3, %v1168_v42, 0.0 }
 0x177   : > { %919 = vadd.xlane.f32.xlu0 %v918_v60  ;;  %v1031_v0 = vadd.f32 %v1030_v56, %v980_v51  ;;  %v852_v3 = vmax.f32 %v780_v36, 0.0  ;;  %v784_v6 = vadd.f32 %v783_v63, %v1980_v4  ;;  %v785_v9 = vpop.f32.mrb[7].mxu0  ;;  %v1027_v11 = vadd.f32 %v1026_v1, %v978_v48 }
 0x178   : > { %v819_v10 = vpop.f32.mrb[4].mxu1  ;;  %v1202_v14 = vadd.f32 %v1201_v2, %v1167_v37  ;;  %v853_v13 = vmax.f32 %v782_v59, 0.0  ;;  %v786_v15 = vadd.f32 %v785_v9, %v1982_v5  ;;  %v1197_v62 = vsel %vm880_vm3, %v1166_v57, 0.0 }
 0x179   : > { %887 = vadd.xlane.f32.xlu1 %v886_v34  ;;  %v820_v16 = vadd.f32 %v819_v10, %v1980_v4  ;;  %v821_v17 = vpop.f32.mrb[5].mxu1  ;;  %v854_v20 = vmax.f32 %v784_v6, 0.0  ;;  %v1198_v22 = vadd.f32 %v1197_v62, %v1165_v18  ;;  %v966_v24 = vmul.f32 %v852_v3, %v852_v3 }
 0x17a   : > { %v822_v21 = vadd.f32 %v821_v17, %v1982_v5  ;;  %v823_v61 = vpop.f32.mrb[6].mxu1  ;;  %v855_v8 = vmax.f32 %v786_v15, 0.0  ;;  %v889_v28 = vsel %vm880_vm3, %v853_v13, 0.0  ;;  %v967_v35 = vmul.f32 %v853_v13, %v853_v13 }
 0x17b   : > { %v2037_v25 = vmax.f32 %v820_v16, 0.0  ;;  %1000 = vadd.xlane.f32.xlu0 %v999_v52  ;;  %v824_v7 = vadd.f32 %v823_v61, %v1980_v4  ;;  %v825_v19 = vpop.f32.mrb[7].mxu1  ;;  %v890_v31 = vadd.f32 %v889_v28, %v852_v3  ;;  %v968_v41 = vmul.f32 %v854_v20, %v854_v20 }
 0x17c   : > { %v2041_v29 = vmax.f32 %v822_v21, 0.0  ;;  %v826_v30 = vadd.f32 %v825_v19, %v1982_v5  ;;  %v893_v18 = vsel %vm880_vm3, %v855_v8, 0.0  ;;  %v1002_v34 = vsel %vm880_vm3, %v967_v35, 0.0 }
 0x17d   : > { %v2044_v38 = vmax.f32 %v824_v7, 0.0  ;;  %996 = vadd.xlane.f32.xlu1 %v995_v53  ;;  %v982_v39 = vmul.f32 %v2037_v25, %v2037_v25  ;;  %v2053_v47 = vadd.f32 %v893_v18, %v854_v20  ;;  %v2057_v49 = vadd.f32 %v1002_v34, %v966_v24 }
 0x17e   : > { %v2049_v44 = vmax.f32 %v826_v30, 0.0  ;;  %v921_v45 = vsel %vm880_vm3, %v2041_v29, 0.0  ;;  %v983_v33 = vmul.f32 %v2041_v29, %v2041_v29  ;;  %v969_v50 = vmul.f32 %v855_v8, %v855_v8 }
 0x17f   : > { %1032 = vadd.xlane.f32.xlu0 %v1031_v0  ;;  %v922_v48 = vadd.f32 %v921_v45, %v2037_v25  ;;  %v1169_v27 = vmul.f32 %v1988_v12, %v852_v3  ;;  %v1170_v52 = vmul.f32 %v1994_v23, %v853_v13  ;;  %v984_v53 = vmul.f32 %v2044_v38, %v2044_v38 }
 0x180   : > { %v925_v51 = vsel %vm880_vm3, %v2049_v44, 0.0  ;;  %v789_v26 = vpop.f32.mrb[8].mxu0  ;;  %v1034_v60 = vsel %vm880_vm3, %v983_v33, 0.0  ;;  %v1006_v54 = vsel %vm880_vm3, %v969_v50, 0.0  ;;  %v985_v37 = vmul.f32 %v2049_v44, %v2049_v44 }
 0x181   : > { %1028 = vadd.xlane.f32.xlu1 %v1027_v11  ;;  %v2068_v43 = vadd.f32 %v925_v51, %v2044_v38  ;;  %v790_v42 = vadd.f32 %v789_v26, %v1980_v4  ;;  %v791_v36 = vpop.f32.mrb[9].mxu0  ;;  %v2075_v55 = vadd.f32 %v1034_v60, %v982_v39  ;;  %v2077_v56 = vadd.f32 %v1006_v54, %v968_v41 }
 0x182   : > { %v1205_v57 = vsel %vm880_vm3, %v1170_v52, 0.0  ;;  %v792_v59 = vadd.f32 %v791_v36, %v1982_v5  ;;  %v793_v63 = vpop.f32.mrb[10].mxu0  ;;  %v1038_v1 = vsel %vm880_vm3, %v985_v37, 0.0  ;;  %v1171_v2 = vmul.f32 %v1988_v12, %v854_v20 }
 0x183   : > { %1203 = vadd.xlane.f32.xlu0 %v1202_v14  ;;  %v2081_v0 = vadd.f32 %v1205_v57, %v1169_v27  ;;  %v856_v3 = vmax.f32 %v790_v42, 0.0  ;;  %v794_v6 = vadd.f32 %v793_v63, %v1980_v4  ;;  %v795_v9 = vpop.f32.mrb[11].mxu0  ;;  %v2086_v11 = vadd.f32 %v1038_v1, %v984_v53 }
 0x184   : > { %v829_v10 = vpop.f32.mrb[8].mxu1  ;;  %v1172_v13 = vmul.f32 %v1994_v23, %v855_v8  ;;  %v857_v14 = vmax.f32 %v792_v59, 0.0  ;;  %v796_v15 = vadd.f32 %v795_v9, %v1982_v5  ;;  %v2093_v62 = vmul.f32 %v1994_v23, %v2000_v32 }
 0x185   : > { %1199 = vadd.xlane.f32.xlu1 %v1198_v22  ;;  %v830_v16 = vadd.f32 %v829_v10, %v1980_v4  ;;  %v831_v17 = vpop.f32.mrb[9].mxu1  ;;  %v858_v20 = vmax.f32 %v794_v6, 0.0  ;;  %v970_v7 = vmul.f32 %v856_v3, %v856_v3  ;;  %v1173_v42 = vmul.f32 %v1988_v12, %v856_v3 }
 0x186   : > { %v832_v21 = vadd.f32 %v831_v17, %v1982_v5  ;;  %v833_v61 = vpop.f32.mrb[10].mxu1  ;;  %v1209_v24 = vsel %vm880_vm3, %v1172_v13, 0.0  ;;  %v859_v8 = vmax.f32 %v796_v15, 0.0  ;;  %v897_v30 = vsel %vm880_vm3, %v857_v14, 0.0 }
 0x187   : > { %891 = vadd.xlane.f32.xlu0 %v890_v31  ;;  %v2097_v22 = vmax.f32 %v830_v16, 0.0  ;;  %v834_v19 = vadd.f32 %v833_v61, %v1980_v4  ;;  %v835_v28 = vpop.f32.mrb[11].mxu1  ;;  %v2104_v18 = vadd.f32 %v897_v30, %v856_v3  ;;  %v2106_v39 = vadd.f32 %v1209_v24, %v1171_v2 }
 0x188   : > { %v2101_v35 = vmax.f32 %v832_v21, 0.0  ;;  %v836_v32 = vadd.f32 %v835_v28, %v1982_v5  ;;  %v901_v31 = vsel %vm880_vm3, %v859_v8, 0.0  ;;  %v971_v45 = vmul.f32 %v857_v14, %v857_v14 }
 0x189   : > { %923 = vadd.xlane.f32.xlu1 %v922_v48  ;;  %v2108_v41 = vmax.f32 %v834_v19, 0.0  ;;  %v986_v34 = vmul.f32 %v2097_v22, %v2097_v22  ;;  %v2117_v51 = vadd.f32 %v901_v31, %v858_v20  ;;  %v972_v53 = vmul.f32 %v858_v20, %v858_v20 }
 0x18a   : > { %v2113_v33 = vmax.f32 %v836_v32, 0.0  ;;  %v929_v50 = vsel %vm880_vm3, %v2101_v35, 0.0  ;;  %v987_v27 = vmul.f32 %v2101_v35, %v2101_v35  ;;  %v1010_v52 = vsel %vm880_vm3, %v971_v45, 0.0 }
 0x18b   : > { %895 = vadd.xlane.f32.xlu0 %v2053_v47  ;;  %v2123_v48 = vadd.f32 %v929_v50, %v2097_v22  ;;  %v973_v26 = vmul.f32 %v859_v8, %v859_v8  ;;  %v2126_v60 = vadd.f32 %v1010_v52, %v970_v7  ;;  %v1174_v63 = vmul.f32 %v1994_v23, %v857_v14 }
 0x18c   : > { %v933_v54 = vsel %vm880_vm3, %v2113_v33, 0.0  ;;  %v1042_v37 = vsel %vm880_vm3, %v987_v27, 0.0  ;;  %v799_v36 = vpop.f32.mrb[12].mxu0  ;;  %v988_v3 = vmul.f32 %v2108_v41, %v2108_v41  ;;  %v1175_v14 = vmul.f32 %v1988_v12, %v858_v20 }
 0x18d   : > { %1004 = vadd.xlane.f32.xlu1 %v2057_v49  ;;  %v2134_v47 = vadd.f32 %v933_v54, %v2108_v41  ;;  %v2136_v57 = vadd.f32 %v1042_v37, %v986_v34  ;;  %v1014_v59 = vsel %vm880_vm3, %v973_v26, 0.0  ;;  %v800_v1 = vadd.f32 %v799_v36, %v1980_v4  ;;  %v801_v2 = vpop.f32.mrb[13].mxu0 }
 0x18e   : > { %v2141_v6 = vadd.f32 %v1014_v59, %v972_v53  ;;  %v989_v49 = vmul.f32 %v2113_v33, %v2113_v33  ;;  %v802_v9 = vadd.f32 %v801_v2, %v1982_v5  ;;  %v803_v10 = vpop.f32.mrb[14].mxu0  ;;  %v1213_v13 = vsel %vm880_vm3, %v1174_v63, 0.0 }
 0x18f   : > { %927 = vadd.xlane.f32.xlu0 %v2068_v43  ;;  %v1176_v15 = vmul.f32 %v1994_v23, %v859_v8  ;;  %v860_v16 = vmax.f32 %v800_v1, 0.0  ;;  %v804_v17 = vadd.f32 %v803_v10, %v1980_v4  ;;  %v805_v21 = vpop.f32.mrb[15].mxu0  ;;  %v2153_v24 = vadd.f32 %v1213_v13, %v1173_v42 }
 0x190   : > { %v839_v61 = vpop.f32.mrb[12].mxu1  ;;  %v1046_v7 = vsel %vm880_vm3, %v989_v49, 0.0  ;;  %v861_v43 = vmax.f32 %v802_v9, 0.0  ;;  %v806_v19 = vadd.f32 %v805_v21, %v1982_v5 }
 0x191   : > { %1036 = vadd.xlane.f32.xlu1 %v2075_v55  ;;  %v840_v28 = vadd.f32 %v839_v61, %v1980_v4  ;;  %v841_v30 = vpop.f32.mrb[13].mxu1  ;;  %v2159_v20 = vadd.f32 %v1046_v7, %v988_v3  ;;  %v2161_v8 = vmax.f32 %v804_v17, 0.0  ;;  %v1217_v45 = vsel %vm880_vm3, %v1176_v15, 0.0 }
 0x192   : > { %v842_v32 = vadd.f32 %v841_v30, %v1982_v5  ;;  %v843_v31 = vpop.f32.mrb[14].mxu1  ;;  %v974_v34 = vmul.f32 %v860_v16, %v860_v16  ;;  %v2166_v50 = vmax.f32 %v806_v19, 0.0  ;;  %v905_v53 = vsel %vm880_vm3, %v861_v43, 0.0 }
 0x193   : > { %1008 = vadd.xlane.f32.xlu0 %v2077_v56  ;;  %v876_v55 = vmax.f32 %v840_v28, 0.0  ;;  %v844_v27 = vadd.f32 %v843_v31, %v1980_v4  ;;  %v845_v52 = vpop.f32.mrb[15].mxu1  ;;  %v2171_v37 = vadd.f32 %v905_v53, %v860_v16  ;;  %v2173_v42 = vadd.f32 %v1217_v45, %v1175_v14 }
 0x194   : > { %v877_v26 = vmax.f32 %v842_v32, 0.0  ;;  %v846_v54 = vadd.f32 %v845_v52, %v1982_v5  ;;  %v909_v56 = vsel %vm880_vm3, %v2166_v50, 0.0  ;;  %v975_v59 = vmul.f32 %v861_v43, %v861_v43 }
 0x195   : > { %1207 = vadd.xlane.f32.xlu1 %v2081_v0  ;;  %v878_v36 = vmax.f32 %v844_v27, 0.0  ;;  %v990_v63 = vmul.f32 %v876_v55, %v876_v55  ;;  %v2180_v2 = vadd.f32 %v909_v56, %v2161_v8  ;;  %v976_v0 = vmul.f32 %v2161_v8, %v2161_v8 }
 0x196   : > { %v879_v1 = vmax.f32 %v846_v54, 0.0  ;;  %v937_v4 = vsel %vm880_vm3, %v877_v26, 0.0  ;;  %v991_v3 = vmul.f32 %v877_v26, %v877_v26  ;;  %v1018_v49 = vsel %vm880_vm3, %v975_v59, 0.0 }
 0x197   : > { %1040 = vadd.xlane.f32.xlu0 %v2086_v11  ;;  %v2183_v5 = vadd.f32 %v937_v4, %v876_v55  ;;  %v977_v9 = vmul.f32 %v2166_v50, %v2166_v50  ;;  %v1019_v10 = vadd.f32 %v1018_v49, %v974_v34  ;;  %v1229_v15 = vsel %vm880_vm3, %v2093_v62, 0.0 }
 0x198   : > { %v941_v13 = vsel %vm880_vm3, %v879_v1, 0.0  ;;  %v1050_v14 = vsel %vm880_vm3, %v991_v3, 0.0  ;;  %v1230_v61 = vadd.f32 %v1229_v15, %v2027_v58  ;;  %v992_v19 = vmul.f32 %v878_v36, %v878_v36 }
 0x199   : > { %899 = vadd.xlane.f32.xlu1 %v2104_v18  ;;  %v942_v11 = vadd.f32 %v941_v13, %v878_v36  ;;  %v1051_v17 = vadd.f32 %v1050_v14, %v990_v63  ;;  %v1022_v21 = vsel %vm880_vm3, %v977_v9, 0.0  ;;  %v993_v28 = vmul.f32 %v879_v1, %v879_v1 }
 0x19a   : > { %v1023_v7 = vadd.f32 %v1022_v21, %v976_v0  ;;  %v1177_v30 = vmul.f32 %v1988_v12, %v860_v16  ;;  %v1178_v32 = vmul.f32 %v1994_v23, %v861_v43  ;;  %v1183_v62 = vmul.f32 %v1988_v12, %v2003_v40 }
 0x19b   : > { %1211 = vadd.xlane.f32.xlu0 %v2106_v39  ;;  %v1184_v18 = vmul.f32 %v1994_v23, %v2006_v46  ;;  %v1185_v31 = vmul.f32 %v1988_v12, %v2037_v25  ;;  %v1054_v58 = vsel %vm880_vm3, %v993_v28, 0.0  ;;  %v1186_v45 = vmul.f32 %v1994_v23, %v2041_v29 }
 0x19c   : > { %v1187_v16 = vmul.f32 %v1988_v12, %v2044_v38  ;;  %v1188_v39 = vmul.f32 %v1994_v23, %v2049_v44  ;;  %v1055_v40 = vadd.f32 %v1054_v58, %v992_v19  ;;  %v1221_v43 = vsel %vm880_vm3, %v1178_v32, 0.0  ;;  %v2258_v19 = vld [vmem:[#allocation2] ss:$0 sm:$0xff] }
 0x19d   : > { %931 = vadd.xlane.f32.xlu1 %v2123_v48  ;;  %v1233_v46 = vsel %vm880_vm3, %v1184_v18, 0.0  ;;  %v1189_v25 = vmul.f32 %v1988_v12, %v2097_v22  ;;  %v1222_v34 = vadd.f32 %v1221_v43, %v1177_v30  ;;  %v1237_v29 = vsel %vm880_vm3, %v1186_v45, 0.0  ;;  %v2262_v45 = vld [vmem:[#allocation3] ss:$0 sm:$0xff] }
 0x19e   : > { %v1234_v27 = vadd.f32 %v1233_v46, %v1183_v62  ;;  %v1241_v52 = vsel %vm880_vm3, %v1188_v39, 0.0  ;;  %v1238_v38 = vadd.f32 %v1237_v29, %v1185_v31  ;;  %v1190_v48 = vmul.f32 %v1994_v23, %v2101_v35 }
 0x19f   : > { %903 = vadd.xlane.f32.xlu0 %v2117_v51  ;;  %v1242_v44 = vadd.f32 %v1241_v52, %v1187_v16  ;;  %v1191_v53 = vmul.f32 %v1988_v12, %v2108_v41  ;;  %v1192_v54 = vmul.f32 %v1994_v23, %v2113_v33  ;;  %v1193_v22 = vmul.f32 %v1988_v12, %v876_v55 }
 0x1a0   : > { %v1194_v56 = vmul.f32 %v1994_v23, %v877_v26  ;;  %v1179_v59 = vmul.f32 %v1988_v12, %v2161_v8  ;;  %v1245_v51 = vsel %vm880_vm3, %v1190_v48, 0.0  ;;  %v1180_v35 = vmul.f32 %v1994_v23, %v2166_v50 }
 0x1a1   : > { %1012 = vadd.xlane.f32.xlu1 %v2126_v60  ;;  %v1195_v63 = vmul.f32 %v1988_v12, %v878_v36  ;;  %v1196_v41 = vmul.f32 %v1994_v23, %v879_v1  ;;  %v1246_v4 = vadd.f32 %v1245_v51, %v1189_v25  ;;  %v1249_v33 = vsel %vm880_vm3, %v1192_v54, 0.0 }
 0x1a2   : > { %v1253_v55 = vsel %vm880_vm3, %v1194_v56, 0.0  ;;  %v1250_v26 = vadd.f32 %v1249_v33, %v1191_v53  ;;  %v1225_v60 = vsel %vm880_vm3, %v1180_v35, 0.0 }
 0x1a3   : > { %935 = vadd.xlane.f32.xlu0 %v2134_v47  ;;  %v1254_v8 = vadd.f32 %v1253_v55, %v1193_v22  ;;  %v1257_v3 = vsel %vm880_vm3, %v1196_v41, 0.0  ;;  %v1226_v49 = vadd.f32 %v1225_v60, %v1179_v59 }
 0x1a4   : > { %v1258_v0 = vadd.f32 %v1257_v3, %v1195_v63 }
 0x1a5   : > { %1044 = vadd.xlane.f32.xlu1 %v2136_v57 }
 0x1a7   : > { %1016 = vadd.xlane.f32.xlu0 %v2141_v6 }
 0x1a9   : > { %1215 = vadd.xlane.f32.xlu1 %v2153_v24 }
 0x1ab   : > { %1048 = vadd.xlane.f32.xlu0 %v2159_v20 }
 0x1ad   : > { %907 = vadd.xlane.f32.xlu1 %v2171_v37 }
 0x1af   : > { %1219 = vadd.xlane.f32.xlu0 %v2173_v42 }
 0x1b1   : > { %939 = vadd.xlane.f32.xlu1 %v2183_v5 }
 0x1b3   : > { %911 = vadd.xlane.f32.xlu0 %v2180_v2 }
 0x1b5   : > { %1020 = vadd.xlane.f32.xlu1 %v1019_v10 }
 0x1b7   : > { %943 = vadd.xlane.f32.xlu0 %v942_v11 }
 0x1b9   : > { %1052 = vadd.xlane.f32.xlu1 %v1051_v17 }
 0x1bb   : > { %1024 = vadd.xlane.f32.xlu0 %v1023_v7 }
 0x1bd   : > { %1231 = vadd.xlane.f32.xlu1 %v1230_v61 }
 0x1bf   : > { %1056 = vadd.xlane.f32.xlu0 %v1055_v40 }
 0x1c1   : > { %1223 = vadd.xlane.f32.xlu1 %v1222_v34 }
 0x1c3   : > { %1235 = vadd.xlane.f32.xlu0 %v1234_v27 }
 0x1c5   : > { %1239 = vadd.xlane.f32.xlu1 %v1238_v38 }
 0x1c7   : > { %1243 = vadd.xlane.f32.xlu0 %v1242_v44 }
 0x1c9   : > { %1247 = vadd.xlane.f32.xlu1 %v1246_v4 }
 0x1cb   : > { %1251 = vadd.xlane.f32.xlu0 %v1250_v26 }
 0x1cd   : > { %1255 = vadd.xlane.f32.xlu1 %v1254_v8 }
 0x1cf   : > { %1227 = vadd.xlane.f32.xlu0 %v1226_v49 }
 0x1d3   : > { %1259 = vadd.xlane.f32.xlu0 %v1258_v0 }
 0x1fe   : > { %v884_v12 = vpop.xlane.xlu0 %883 }
 0x1ff   : > { %v946_v6 = vmul.f32 0.006666667, %v884_v12 }
 0x201   : > { %v1074_v36 = vmul.f32 %v946_v6, %v946_v6  ;;  %v1267_v18 = vmul.f32 %v2258_v19, %v946_v6 }
 0x202   : > { %v2250_v23 = vpop.xlane.xlu1 %915 }
 0x204   : > { %v2252_v47 = vpop.xlane.xlu0 %919 }
 0x206   : > { %v888_v57 = vpop.xlane.xlu1 %887 }
 0x207   : > { %v947_v24 = vmul.f32 0.006666667, %v888_v57  ;;  %v2280_v57 = vmul.f32 0.006666667, %v2250_v23 }
 0x208   : > { %v1001_v20 = vpop.xlane.xlu0 %1000 }
 0x209   : > { %v1075_v50 = vmul.f32 %v947_v24, %v947_v24  ;;  %v1059_v37 = vmul.f32 0.006666667, %v1001_v20  ;;  %v1268_v30 = vmul.f32 %v2258_v19, %v947_v24  ;;  %v1082_v23 = vmul.f32 %v2280_v57, %v2280_v57 }
 0x20a   : > { %v997_v42 = vpop.xlane.xlu1 %996 }
 0x20b   : > { %v1091_v1 = vsub.f32 %v1059_v37, %v1075_v50  ;;  %v1058_v2 = vmul.f32 0.006666667, %v997_v42 }
 0x20c   : > { %v2254_v5 = vpop.xlane.xlu0 %1032 }
 0x20d   : > { %v1107_v9 = vmax.f32 %v1091_v1, 0.0  ;;  %v1090_v10 = vsub.f32 %v1058_v2, %v1074_v36 }
 0x20e   : > { %v1029_v13 = vpop.xlane.xlu1 %1028 }
 0x20f   : > { %v1123_v14 = vadd.f32 1e-05, %v1107_v9  ;;  %v1106_v15 = vmax.f32 %v1090_v10, 0.0  ;;  %v1066_v42 = vmul.f32 0.006666667, %v1029_v13 }
 0x210   : > { %v1204_v11 = vpop.xlane.xlu0 %1203 }
 0x211   : > { %1625 = vrsqrt.f32 %v1123_v14  ;;  %v1122_v17 = vadd.f32 1e-05, %v1106_v15  ;;  %v1284_v62 = vsub.f32 %v1204_v11, %v1268_v30  ;;  %v2291_v14 = vmul.f32 0.006666667, %v2252_v47 }
 0x212   : > { %v1200_v21 = vpop.xlane.xlu1 %1199  ;;  %v1067_v11 = vmul.f32 0.006666667, %v2254_v5 }
 0x213   : > { %1627 = vrsqrt.f32 %v1122_v17  ;;  %v1283_v43 = vsub.f32 %v1200_v21, %v1267_v18  ;;  %v1098_v21 = vsub.f32 %v1066_v42, %v1082_v23  ;;  %v1083_v18 = vmul.f32 %v2291_v14, %v2291_v14 }
 0x214   : > { %v892_v61 = vpop.xlane.xlu0 %891 }
 0x215   : > { %v948_v28 = vmul.f32 0.006666667, %v892_v61 }
 0x216   : > { %v2256_v7 = vpop.xlane.xlu1 %923 }
 0x217   : > { %v1076_v16 = vmul.f32 %v948_v28, %v948_v28  ;;  %v1269_v55 = vmul.f32 %v2258_v19, %v948_v28 }
 0x218   : > { %v896_v32 = vpop.xlane.xlu0 %895 }
 0x219   : > { %v949_v34 = vmul.f32 0.006666667, %v896_v32 }
 0x21a   : > { %v1005_v31 = vpop.xlane.xlu1 %1004 }
 0x21b   : > { %v1626_v58 = vpop.eup %1625  ;;  %v1060_v39 = vmul.f32 0.006666667, %v1005_v31  ;;  %v1077_v54 = vmul.f32 %v949_v34, %v949_v34  ;;  %v1270_v50 = vmul.f32 %v2258_v19, %v949_v34  ;;  %v2300_v31 = vmul.f32 0.006666667, %v2256_v7 }
 0x21c   : > { %v1300_v40 = vmul.f32 %v1626_v58, %v1284_v62  ;;  %v2264_v46 = vpop.xlane.xlu0 %927  ;;  %v1099_v58 = vsub.f32 %v1067_v11, %v1083_v18  ;;  %v1275_v11 = vmul.f32 %v2258_v19, %v2280_v57 }
 0x21d   : > { %v1628_v25 = vpop.eup %1627  ;;  %v1092_v27 = vsub.f32 %v1060_v39, %v1076_v16  ;;  %v1114_v16 = vmax.f32 %v1098_v21, 0.0  ;;  %v2305_v39 = vmul.f32 0.006666667, %v2264_v46 }
 0x21e   : > { %v1322_v29 = vadd.f32 %v2262_v45, %v1300_v40  ;;  %v1299_v52 = vmul.f32 %v1628_v25, %v1283_v43  ;;  %v1037_v38 = vpop.xlane.xlu1 %1036 }
 0x21f   : > { %v1108_v44 = vmax.f32 %v1092_v27, 0.0  ;;  %v1068_v43 = vmul.f32 0.006666667, %v1037_v38 }
 0x220   : > { %1339 = vst.msk [vmem:[%s2270_s6 + $0x8] sm:$0xff] %vm1337_vm4, %v1322_v29  ;;  %v1321_v48 = vadd.f32 %v2262_v45, %v1299_v52  ;;  %v1009_v53 = vpop.xlane.xlu0 %1008  ;;  %v1084_v29 = vmul.f32 %v2300_v31, %v2300_v31 }
 0x221   : > { %v1124_v22 = vadd.f32 1e-05, %v1108_v44  ;;  %v1061_v56 = vmul.f32 0.006666667, %v1009_v53  ;;  %v1115_v44 = vmax.f32 %v1099_v58, 0.0  ;;  %v1085_v53 = vmul.f32 %v2305_v39, %v2305_v39 }
 0x222   : > { %1338 = vst.msk [vmem:[%s2270_s6] sm:$0xff] %vm1337_vm4, %v1321_v48  ;;  %v1208_v59 = vpop.xlane.xlu1 %1207  ;;  %v1130_v48 = vadd.f32 1e-05, %v1114_v16 }
 0x223   : > { %1629 = vrsqrt.f32 %v1124_v22  ;;  %v1093_v51 = vsub.f32 %v1061_v56, %v1077_v54  ;;  %v1285_v60 = vsub.f32 %v1208_v59, %v1269_v55  ;;  %v1100_v54 = vsub.f32 %v1068_v43, %v1084_v29 }
 0x224   : > { %v1041_v35 = vpop.xlane.xlu0 %1040  ;;  %v1131_v55 = vadd.f32 1e-05, %v1115_v44 }
 0x225   : > { %v1109_v63 = vmax.f32 %v1093_v51, 0.0  ;;  %v1069_v34 = vmul.f32 0.006666667, %v1041_v35 }
 0x226   : > { %v900_v41 = vpop.xlane.xlu1 %899 }
 0x227   : > { %v1125_v4 = vadd.f32 1e-05, %v1109_v63  ;;  %v950_v8 = vmul.f32 0.006666667, %v900_v41  ;;  %v1101_v59 = vsub.f32 %v1069_v34, %v1085_v53 }
 0x228   : > { %v1212_v33 = vpop.xlane.xlu0 %1211 }
 0x229   : > { %1631 = vrsqrt.f32 %v1125_v4  ;;  %v1078_v6 = vmul.f32 %v950_v8, %v950_v8  ;;  %v1286_v2 = vsub.f32 %v1212_v33, %v1270_v50  ;;  %v1271_v38 = vmul.f32 %v2258_v19, %v950_v8 }
 0x22a   : > { %v932_v26 = vpop.xlane.xlu1 %931 }
 0x22b   : > { %v2309_v52 = vmul.f32 0.006666667, %v932_v26  ;;  %v1116_v26 = vmax.f32 %v1100_v54, 0.0 }
 0x22c   : > { %v904_v3 = vpop.xlane.xlu0 %903 }
 0x22d   : > { %v1630_v49 = vpop.eup %1629  ;;  %v2284_v36 = vmul.f32 0.006666667, %v904_v3  ;;  %v1086_v35 = vmul.f32 %v2309_v52, %v2309_v52 }
 0x22e   : > { %v1301_v0 = vmul.f32 %v1630_v49, %v1285_v60  ;;  %v1013_v12 = vpop.xlane.xlu1 %1012 }
 0x22f   : > { %v1062_v24 = vmul.f32 0.006666667, %v1013_v12  ;;  %v1079_v61 = vmul.f32 %v2284_v36, %v2284_v36 }
 0x230   : > { %v1323_v20 = vadd.f32 %v2262_v45, %v1301_v0  ;;  %v936_v37 = vpop.xlane.xlu0 %935  ;;  %v1117_v0 = vmax.f32 %v1101_v59, 0.0 }
 0x231   : > { %v1094_v1 = vsub.f32 %v1062_v24, %v1078_v6  ;;  %v2313_v46 = vmul.f32 0.006666667, %v936_v37  ;;  %v1272_v37 = vmul.f32 %v2258_v19, %v2284_v36 }
 0x232   : > { %1340 = vst.msk [vmem:[%s2270_s6 + $0x10] sm:$0xff] %vm1337_vm4, %v1323_v20  ;;  %v1045_v9 = vpop.xlane.xlu1 %1044 }
 0x233   : > { %v1632_v10 = vpop.eup %1631  ;;  %v1110_v15 = vmax.f32 %v1094_v1, 0.0  ;;  %v1070_v22 = vmul.f32 0.006666667, %v1045_v9  ;;  %v1087_v60 = vmul.f32 %v2313_v46, %v2313_v46  ;;  %v1132_v9 = vadd.f32 1e-05, %v1116_v26 }
 0x234   : > { %v1302_v17 = vmul.f32 %v1632_v10, %v1286_v2  ;;  %v1017_v13 = vpop.xlane.xlu0 %1016  ;;  %v1277_v26 = vmul.f32 %v2258_v19, %v2300_v31 }
 0x235   : > { %v1126_v28 = vadd.f32 1e-05, %v1110_v15  ;;  %v1063_v30 = vmul.f32 0.006666667, %v1017_v13  ;;  %v1102_v3 = vsub.f32 %v1070_v22, %v1086_v35  ;;  %v1276_v35 = vmul.f32 %v2258_v19, %v2291_v14 }
 0x236   : > { %v1324_v32 = vadd.f32 %v2262_v45, %v1302_v17  ;;  %v1216_v62 = vpop.xlane.xlu1 %1215  ;;  %v1278_v14 = vmul.f32 %v2258_v19, %v2305_v39 }
 0x237   : > { %1633 = vrsqrt.f32 %v1126_v28  ;;  %v1095_v47 = vsub.f32 %v1063_v30, %v1079_v61  ;;  %v1287_v63 = vsub.f32 %v1216_v62, %v1271_v38  ;;  %v1118_v10 = vmax.f32 %v1102_v3, 0.0 }
 0x238   : > { %1341 = vst.msk [vmem:[%s2270_s6 + $0x18] sm:$0xff] %vm1337_vm4, %v1324_v32  ;;  %v1049_v5 = vpop.xlane.xlu0 %1048  ;;  %v1133_v61 = vadd.f32 1e-05, %v1117_v0 }
 0x239   : > { %v1111_v40 = vmax.f32 %v1095_v47, 0.0  ;;  %v1071_v41 = vmul.f32 0.006666667, %v1049_v5  ;;  %v1134_v58 = vadd.f32 1e-05, %v1118_v10 }
 0x23a   : > { %v908_v25 = vpop.xlane.xlu1 %907 }
 0x23b   : > { %v1127_v27 = vadd.f32 1e-05, %v1111_v40  ;;  %v2316_v51 = vmul.f32 0.006666667, %v908_v25  ;;  %v1103_v50 = vsub.f32 %v1071_v41, %v1087_v60 }
 0x23c   : > { %v1220_v7 = vpop.xlane.xlu0 %1219 }
 0x23d   : > { %1635 = vrsqrt.f32 %v1127_v27  ;;  %v1080_v12 = vmul.f32 %v2316_v51, %v2316_v51  ;;  %v1288_v23 = vsub.f32 %v1220_v7, %v1272_v37  ;;  %v1119_v28 = vmax.f32 %v1103_v50, 0.0 }
 0x23e   : > { %v940_v56 = vpop.xlane.xlu1 %939  ;;  %1637 = vrsqrt.f32 %v1130_v48  ;;  %v1273_v60 = vmul.f32 %v2258_v19, %v2316_v51  ;;  %v1279_v51 = vmul.f32 %v2258_v19, %v2309_v52 }
 0x23f   : > { %v2324_v6 = vmul.f32 0.006666667, %v940_v56  ;;  %1639 = vrsqrt.f32 %v1131_v55  ;;  %v1135_v29 = vadd.f32 1e-05, %v1119_v28 }
 0x240   : > { %v912_v4 = vpop.xlane.xlu0 %911  ;;  %1641 = vrsqrt.f32 %v1132_v9 }
 0x241   : > { %v1634_v33 = vpop.eup %1633  ;;  %v2329_v42 = vmul.f32 0.006666667, %v912_v4  ;;  %v1088_v13 = vmul.f32 %v2324_v6, %v2324_v6  ;;  %v1281_v28 = vmul.f32 %v2258_v19, %v2324_v6 }
 0x242   : > { %v1303_v8 = vmul.f32 %v1634_v33, %v1287_v63  ;;  %v1021_v49 = vpop.xlane.xlu1 %1020 }
 0x243   : > { %v1064_v24 = vmul.f32 0.006666667, %v1021_v49  ;;  %v1081_v32 = vmul.f32 %v2329_v42, %v2329_v42 }
 0x244   : > { %v1325_v20 = vadd.f32 %v2262_v45, %v1303_v8  ;;  %v944_v1 = vpop.xlane.xlu0 %943 }
 0x245   : > { %v1096_v2 = vsub.f32 %v1064_v24, %v1080_v12  ;;  %v2339_v47 = vmul.f32 0.006666667, %v944_v1 }
 0x246   : > { %1342 = vst.msk [vmem:[%s2270_s6 + $0x20] sm:$0xff] %vm1337_vm4, %v1325_v20  ;;  %v1053_v15 = vpop.xlane.xlu1 %1052 }
 0x247   : > { %v1636_v17 = vpop.eup %1635  ;;  %v1112_v21 = vmax.f32 %v1096_v2, 0.0  ;;  %v1072_v36 = vmul.f32 0.006666667, %v1053_v15  ;;  %v1089_v44 = vmul.f32 %v2339_v47, %v2339_v47 }
 0x248   : > { %v1304_v30 = vmul.f32 %v1636_v17, %v1288_v23  ;;  %v1025_v62 = vpop.xlane.xlu0 %1024  ;;  %v1638_v43 = vpop.eup %1637 }
 0x249   : > { %v1128_v18 = vadd.f32 1e-05, %v1112_v21  ;;  %v1104_v5 = vsub.f32 %v1072_v36, %v1088_v13  ;;  %v1065_v57 = vmul.f32 0.006666667, %v1025_v62  ;;  %v1640_v4 = vpop.eup %1639 }
 0x24a   : > { %v1326_v16 = vadd.f32 %v2262_v45, %v1304_v30  ;;  %v1232_v40 = vpop.xlane.xlu1 %1231  ;;  %v1642_v0 = vpop.eup %1641 }
 0x24b   : > { %1643 = vrsqrt.f32 %v1128_v18  ;;  %v1120_v25 = vmax.f32 %v1104_v5, 0.0  ;;  %v1097_v34 = vsub.f32 %v1065_v57, %v1081_v32  ;;  %v1291_v27 = vsub.f32 %v1232_v40, %v1275_v11 }
 0x24c   : > { %1645 = vrsqrt.f32 %v1133_v61  ;;  %1343 = vst.msk [vmem:[%s2270_s6 + $0x28] sm:$0xff] %vm1337_vm4, %v1326_v16  ;;  %v1057_v7 = vpop.xlane.xlu0 %1056  ;;  %v1280_v11 = vmul.f32 %v2258_v19, %v2313_v46  ;;  %v1274_v5 = vmul.f32 %v2258_v19, %v2329_v42 }
 0x24d   : > { %v1113_v48 = vmax.f32 %v1097_v34, 0.0  ;;  %v1307_v53 = vmul.f32 %v1638_v43, %v1291_v27  ;;  %v1073_v54 = vmul.f32 0.006666667, %v1057_v7  ;;  %1647 = vrsqrt.f32 %v1134_v58 }
 0x24e   : > { %v1136_v22 = vadd.f32 1e-05, %v1120_v25  ;;  %v1224_v38 = vpop.xlane.xlu1 %1223  ;;  %1649 = vrsqrt.f32 %v1135_v29  ;;  %v1282_v27 = vmul.f32 %v2258_v19, %v2339_v47 }
 0x24f   : > { %v1329_v56 = vadd.f32 %v2262_v45, %v1307_v53  ;;  %v1105_v59 = vsub.f32 %v1073_v54, %v1089_v44  ;;  %v1129_v63 = vadd.f32 1e-05, %v1113_v48  ;;  %v1289_v24 = vsub.f32 %v1224_v38, %v1273_v60 }
 0x250   : > { %v1236_v41 = vpop.xlane.xlu0 %1235  ;;  %1651 = vrsqrt.f32 %v1136_v22 }
 0x251   : > { %1346 = vst.msk [vmem:[%s2270_s6 + $0x40] sm:$0xff] %vm1337_vm4, %v1329_v56  ;;  %v1121_v33 = vmax.f32 %v1105_v59, 0.0  ;;  %v1292_v55 = vsub.f32 %v1236_v41, %v1276_v35  ;;  %1653 = vrsqrt.f32 %v1129_v63 }
 0x252   : > { %v1240_v3 = vpop.xlane.xlu1 %1239 }
 0x253   : > { %v1308_v8 = vmul.f32 %v1640_v4, %v1292_v55  ;;  %v1293_v49 = vsub.f32 %v1240_v3, %v1277_v26  ;;  %v1137_v12 = vadd.f32 1e-05, %v1121_v33 }
 0x254   : > { %v1244_v20 = vpop.xlane.xlu0 %1243 }
 0x255   : > { %v1644_v50 = vpop.eup %1643  ;;  %v1330_v37 = vadd.f32 %v2262_v45, %v1308_v8  ;;  %v1309_v31 = vmul.f32 %v1642_v0, %v1293_v49  ;;  %v1294_v1 = vsub.f32 %v1244_v20, %v1278_v14  ;;  %1655 = vrsqrt.f32 %v1137_v12 }
 0x256   : > { %v1646_v2 = vpop.eup %1645  ;;  %v1305_v9 = vmul.f32 %v1644_v50, %v1289_v24  ;;  %v1248_v10 = vpop.xlane.xlu1 %1247 }
 0x257   : > { %1347 = vst.msk [vmem:[%s2270_s6 + $0x48] sm:$0xff] %vm1337_vm4, %v1330_v37  ;;  %v1331_v39 = vadd.f32 %v2262_v45, %v1309_v31  ;;  %v1310_v23 = vmul.f32 %v1646_v2, %v1294_v1  ;;  %v1295_v15 = vsub.f32 %v1248_v10, %v1279_v51  ;;  %v1648_v17 = vpop.eup %1647 }
 0x258   : > { %v1327_v13 = vadd.f32 %v2262_v45, %v1305_v9  ;;  %v1252_v21 = vpop.xlane.xlu0 %1251  ;;  %v1650_v30 = vpop.eup %1649 }
 0x259   : > { %1348 = vst.msk [vmem:[%s2270_s6 + $0x50] sm:$0xff] %vm1337_vm4, %v1331_v39  ;;  %v1332_v52 = vadd.f32 %v2262_v45, %v1310_v23  ;;  %v1311_v36 = vmul.f32 %v1648_v17, %v1295_v15  ;;  %v1296_v61 = vsub.f32 %v1252_v21, %v1280_v11 }
 0x25a   : > { %1344 = vst.msk [vmem:[%s2270_s6 + $0x30] sm:$0xff] %vm1337_vm4, %v1327_v13  ;;  %v1256_v46 = vpop.xlane.xlu1 %1255  ;;  %v1652_v57 = vpop.eup %1651 }
 0x25b   : > { %1349 = vst.msk [vmem:[%s2270_s6 + $0x58] sm:$0xff] %vm1337_vm4, %v1332_v52  ;;  %v1333_v32 = vadd.f32 %v2262_v45, %v1311_v36  ;;  %v1312_v62 = vmul.f32 %v1650_v30, %v1296_v61  ;;  %v1297_v18 = vsub.f32 %v1256_v46, %v1281_v28  ;;  %v1654_v43 = vpop.eup %1653 }
 0x25c   : > { %v1228_v58 = vpop.xlane.xlu0 %1227 }
 0x25d   : > { %1350 = vst.msk [vmem:[%s2270_s6 + $0x60] sm:$0xff] %vm1337_vm4, %v1333_v32  ;;  %v1334_v6 = vadd.f32 %v2262_v45, %v1312_v62  ;;  %v1313_v16 = vmul.f32 %v1652_v57, %v1297_v18  ;;  %v1290_v40 = vsub.f32 %v1228_v58, %v1274_v5 }
 0x25f   : > { %1351 = vst.msk [vmem:[%s2270_s6 + $0x68] sm:$0xff] %vm1337_vm4, %v1334_v6  ;;  %v1335_v25 = vadd.f32 %v2262_v45, %v1313_v16  ;;  %v1306_v34 = vmul.f32 %v1654_v43, %v1290_v40  ;;  %v1656_v44 = vpop.eup %1655 }
 0x260   : > { %v1260_v42 = vpop.xlane.xlu0 %1259 }
 0x261   : > { %1352 = vst.msk [vmem:[%s2270_s6 + $0x70] sm:$0xff] %vm1337_vm4, %v1335_v25  ;;  %v1328_v29 = vadd.f32 %v2262_v45, %v1306_v34  ;;  %v1298_v7 = vsub.f32 %v1260_v42, %v1282_v27 }
 0x263   : > { %1345 = vst.msk [vmem:[%s2270_s6 + $0x38] sm:$0xff] %vm1337_vm4, %v1328_v29  ;;  %v1314_v48 = vmul.f32 %v1656_v44, %v1298_v7 }
 0x265   : > { %v1336_v53 = vadd.f32 %v2262_v45, %v1314_v48 }
 0x267   : > { %1353 = vst.msk [vmem:[%s2270_s6 + $0x78] sm:$0xff] %vm1337_vm4, %v1336_v53 }
 0x268 PF: > { %s21_s28 = sadd.s32 1, %s1663_s28  }
 0x269   : > { %p18_p4 = scmp.ge.s32.totalorder %s21_s28, 4  }
 0x26b   :  { %20 = sbr.rel (!%p18_p4) target bundleno = 3 (0x3), region = 81 }

</bundles_post_ra>
